<compile_context>
chip_gen: v7x
topology: tpu7x:2x2x1
jax: 0.10.0
libtpu: 0.0.40
codegen_flags: <defaults>
</compile_context>

<pallas_src>
import functools

import jax
import jax.numpy as jnp
from jax.experimental import pallas as pl
from jax.experimental.pallas import tpu as pltpu


# ----------------------------------------------------------------------------
# Fused kernel: depthwise 3x3 conv + eval-BN (q|k|v packed on lanes) + packed
# QKV projection + multi-head attention + (folded) output projection.
# ----------------------------------------------------------------------------
def _cvt_attn_kernel(x_ref, wconv_ref, bnsc_ref, bnsh_ref, wbig_ref, bproj_ref,
                     o_ref, xpad_ref, qkv_ref,
                     *, H, W, T, Tp, C, D, num_heads, head_dim):
    C3 = 3 * C
    hd = head_dim

    # ---------------- depthwise 3x3 conv + folded eval BatchNorm -------------
    x = x_ref[0]                                   # (T, C) f32
    cls = x[0:1, :]                                # (1, C) cls token
    xsp = x[1:T, :].reshape(H, W, C)               # (H, W, C) spatial body

    # Zero-padded, channel-tripled image staged once in a VMEM scratch
    # (replaces the chain of jnp.concatenate pads / lane triplication).
    xpad_ref[...] = jnp.zeros_like(xpad_ref)                     # (H+2, W+2, 3C)
    xpad_ref[1:H + 1, 1:W + 1, :] = jnp.concatenate([xsp, xsp, xsp], axis=-1)

    wconv = wconv_ref[...]                                       # (3, 3, 3C)
    acc = jnp.zeros((H, W, C3), jnp.float32)
    for dh in range(3):                                          # static 3x3 taps
        for dw in range(3):
            acc = acc + xpad_ref[dh:dh + H, dw:dw + W, :] * wconv[dh, dw, :]
    y = acc * bnsc_ref[0] + bnsh_ref[0]                          # folded eval BN

    # ---------------- sequence assembly: [cls | conv body | zero pad] --------
    qkv_ref[...] = jnp.zeros_like(qkv_ref)         # zero pad rows keep softmax finite
    qkv_ref[0:1, :] = jnp.concatenate([cls, cls, cls], axis=-1)
    qkv_ref[1:T, :] = y.reshape(H * W, C3)

    # ---------------- one packed projection (single MXU pass) ----------------
    # Columns: [ q (D, scale folded) | k (D) | per-head fused Wv@Wp (nh*D) ].
    qkv = qkv_ref[...].astype(jnp.bfloat16)                      # (Tp, 3C)
    proj = jnp.dot(qkv, wbig_ref[...],
                   preferred_element_type=jnp.float32)           # (Tp, 2D+nh*D) f32

    # Additive key mask for padded sequence rows (one vreg, shared by all heads).
    key_idx = jax.lax.broadcasted_iota(jnp.int32, (1, Tp), 1)
    kbias = jnp.where(key_idx < T, 0.0, -1e30)                   # (1, Tp) f32

    # ---------------- per-head attention with folded output projection -------
    out = jnp.zeros((Tp, D), jnp.float32)
    for h in range(num_heads):
        qh = proj[:, h * hd:(h + 1) * hd].astype(jnp.bfloat16)             # (Tp, hd)
        kh = proj[:, D + h * hd: D + (h + 1) * hd].astype(jnp.bfloat16)    # (Tp, hd)
        vph = proj[:, 2 * D + h * D: 2 * D + (h + 1) * D].astype(jnp.bfloat16)  # (Tp, D)

        s = jax.lax.dot_general(qh, kh, (((1,), (1,)), ((), ())),
                                preferred_element_type=jnp.float32)        # (Tp, Tp)
        s = s + kbias
        m = jnp.max(s, axis=-1, keepdims=True)
        p = jnp.exp(s - m)
        l = jnp.sum(p, axis=-1, keepdims=True)
        p = p * pl.reciprocal(l, approx=True)

        out = out + jnp.dot(p.astype(jnp.bfloat16), vph,
                            preferred_element_type=jnp.float32)            # (Tp, D)

    o_ref[0] = out + bproj_ref[...]


def cvt_attention_fused(x, wconv3, bn_scale3, bn_shift3, wbig, bproj,
                        *, H, W, num_heads):
    B, T, C = x.shape
    C3 = 3 * C
    D = bproj.shape[-1]
    Np = wbig.shape[-1]
    hd = D // num_heads
    Tp = ((T + 127) // 128) * 128                 # lane-dense padded sequence length

    kern = functools.partial(_cvt_attn_kernel, H=H, W=W, T=T, Tp=Tp, C=C, D=D,
                             num_heads=num_heads, head_dim=hd)
    out = pl.pallas_call(
        kern,
        out_shape=jax.ShapeDtypeStruct((B, Tp, D), jnp.float32),
        grid=(B,),
        in_specs=[
            pl.BlockSpec((1, T, C), lambda b: (b, 0, 0)),
            pl.BlockSpec((3, 3, C3), lambda b: (0, 0, 0)),
            pl.BlockSpec((1, C3), lambda b: (0, 0)),
            pl.BlockSpec((1, C3), lambda b: (0, 0)),
            pl.BlockSpec((C3, Np), lambda b: (0, 0)),
            pl.BlockSpec((1, D), lambda b: (0, 0)),
        ],
        out_specs=pl.BlockSpec((1, Tp, D), lambda b: (b, 0, 0)),
        scratch_shapes=[
            pltpu.VMEM((H + 2, W + 2, C3), jnp.float32),   # padded conv input
            pltpu.VMEM((Tp, C3), jnp.float32),             # packed [q|k|v] sequence
        ],
        compiler_params=pltpu.CompilerParams(
            dimension_semantics=("parallel",),
            vmem_limit_bytes=32 * 1024 * 1024),
    )(x, wconv3, bn_scale3.reshape(1, C3), bn_shift3.reshape(1, C3),
      wbig, bproj.reshape(1, D))
    return out[:, :T, :]                          # drop padded sequence rows


# ----------------------------------------------------------------------------
# Module wrapper
# ----------------------------------------------------------------------------
class CvtAttentionPallas:
    def __init__(self, dim_in, dim_out, num_heads, key):
        assert dim_out % num_heads == 0
        self.dim_in, self.dim_out, self.num_heads = dim_in, dim_out, num_heads
        C, D, nh = dim_in, dim_out, num_heads
        hd = D // nh
        self.scale = dim_out ** (-0.5)
        ks = jax.random.split(key, 20)
        init = lambda k, shape, s=0.1: (s * jax.random.normal(k, shape)).astype(jnp.float32)

        # Depthwise conv weights for q/k/v paths, packed HWC -> (3, 3, 3C).
        conv_w = [init(ks[i], (3, 3, C)) for i in range(3)]
        self.conv_w3 = jnp.concatenate(conv_w, axis=-1)

        # Eval-mode BatchNorm folded into per-channel scale/shift, packed (3C,).
        eps = 1e-5
        scales, shifts = [], []
        for i in range(3):
            gamma = 1.0 + 0.05 * jax.random.normal(ks[3 + i], (C,)).astype(jnp.float32)
            beta = 0.05 * jax.random.normal(ks[6 + i], (C,)).astype(jnp.float32)
            rmean = 0.05 * jax.random.normal(ks[9 + i], (C,)).astype(jnp.float32)
            rvar = jnp.abs(1.0 + 0.05 * jax.random.normal(ks[12 + i], (C,))).astype(jnp.float32)
            sc = gamma * jax.lax.rsqrt(rvar + eps)
            scales.append(sc)
            shifts.append(beta - rmean * sc)
        self.bn_scale3 = jnp.concatenate(scales)
        self.bn_shift3 = jnp.concatenate(shifts)

        # Linear projections (qkv_bias=False) + output projection (with bias).
        wq = init(ks[15], (C, D))
        wk = init(ks[16], (C, D))
        wv = init(ks[17], (C, D))
        wp = init(ks[18], (D, D))
        self.bp = init(ks[19], (D,))

        # One packed projection matrix (3C, 2D + nh*D):
        #  rows [0:C)   -> q path (softmax scale folded in),
        #  rows [C:2C)  -> k path,
        #  rows [2C:3C) -> per-head fused  wv_h @ wp_h  (output projection folded in).
        Np = 2 * D + nh * D
        wbig = jnp.zeros((3 * C, Np), jnp.float32)
        wbig = wbig.at[0:C, 0:D].set(wq * self.scale)
        wbig = wbig.at[C:2 * C, D:2 * D].set(wk)
        for h in range(nh):
            wvp_h = wv[:, h * hd:(h + 1) * hd] @ wp[h * hd:(h + 1) * hd, :]
            wbig = wbig.at[2 * C:3 * C, 2 * D + h * D: 2 * D + (h + 1) * D].set(wvp_h)
        self.wbig = wbig.astype(jnp.bfloat16)

        # Unfused params kept only for the pure-JAX reference check.
        self._ref = dict(conv_w=conv_w, bn_sc=scales, bn_sh=shifts,
                         wq=wq, wk=wk, wv=wv, wp=wp, bp=self.bp)
        # TODO(synk): attn_drop / proj_drop have p=0 -> identity; not implemented as RNG dropout.

    def __call__(self, x, h, w):
        B, T, C = x.shape
        assert T == 1 + h * w and C == self.dim_in
        return cvt_attention_fused(x, self.conv_w3, self.bn_scale3, self.bn_shift3,
                                   self.wbig, self.bp, H=h, W=w,
                                   num_heads=self.num_heads)

    def reference(self, x, h, w):
        # Pure-JAX mirror of the PyTorch forward (eval mode, dropout p=0).
        C, D, nh = self.dim_in, self.dim_out, self.num_heads
        hd = D // nh
        p = self._ref
        B = x.shape[0]
        cls, body = x[:, :1, :], x[:, 1:, :]
        xsp = body.reshape(B, h, w, C)
        xpad = jnp.pad(xsp, ((0, 0), (1, 1), (1, 1), (0, 0)))

        def conv_bn(wc, sc, sh):
            acc = jnp.zeros_like(xsp)
            for dh in range(3):
                for dw in range(3):
                    acc = acc + xpad[:, dh:dh + h, dw:dw + w, :] * wc[dh, dw, :]
            y = acc * sc + sh
            return jnp.concatenate([cls, y.reshape(B, h * w, C)], axis=1)

        qs = conv_bn(p["conv_w"][0], p["bn_sc"][0], p["bn_sh"][0])
        ks_ = conv_bn(p["conv_w"][1], p["bn_sc"][1], p["bn_sh"][1])
        vs = conv_bn(p["conv_w"][2], p["bn_sc"][2], p["bn_sh"][2])
        hp = jax.lax.Precision.HIGHEST
        q = jnp.einsum("btc,cd->btd", qs, p["wq"], precision=hp)
        k = jnp.einsum("btc,cd->btd", ks_, p["wk"], precision=hp)
        v = jnp.einsum("btc,cd->btd", vs, p["wv"], precision=hp)
        T_ = q.shape[1]
        q = q.reshape(B, T_, nh, hd).transpose(0, 2, 1, 3)
        k = k.reshape(B, T_, nh, hd).transpose(0, 2, 1, 3)
        v = v.reshape(B, T_, nh, hd).transpose(0, 2, 1, 3)
        s = jnp.einsum("bhld,bhtd->bhlt", q, k, precision=hp) * self.scale
        a = jax.nn.softmax(s, axis=-1)
        ctx = jnp.einsum("bhlt,bhtd->bhld", a, v, precision=hp)
        ctx = ctx.transpose(0, 2, 1, 3).reshape(B, T_, D)
        return jnp.einsum("btd,de->bte", ctx, p["wp"], precision=hp) + p["bp"]


if __name__ == "__main__":
    B, H, W = 2, 8, 8
    dim_in = dim_out = 32
    num_heads = 2
    T = 1 + H * W

    key = jax.random.PRNGKey(0)
    kx, kp = jax.random.split(key)
    x = jax.random.normal(kx, (B, T, dim_in), dtype=jnp.float32)

    mod = CvtAttentionPallas(dim_in, dim_out, num_heads, kp)
    out = jax.block_until_ready(mod(x, H, W))
    assert out.shape == (B, T, dim_out) and out.dtype == jnp.float32
    assert bool(jnp.all(jnp.isfinite(out)))

    # Correctness vs. pure-JAX reference (bf16 MXU inputs -> loose tolerance).
    ref = jax.block_until_ready(mod.reference(x, H, W))
    assert bool(jnp.allclose(out, ref, atol=2e-2, rtol=2e-2))
    print("KERNEL_OK")
</pallas_src>

<mosaic_0001>
module attributes {stable_mosaic.version = 11 : i64} {
  func.func @_cvt_attn_kernel(%arg0: i32, %arg1: memref<1x65x32xf32, #tpu.memory_space<vmem>>, %arg2: memref<3x3x96xf32, #tpu.memory_space<vmem>>, %arg3: memref<1x96xf32, #tpu.memory_space<vmem>>, %arg4: memref<1x96xf32, #tpu.memory_space<vmem>>, %arg5: memref<96x128xbf16, #tpu.memory_space<vmem>>, %arg6: memref<1x32xf32, #tpu.memory_space<vmem>>, %arg7: memref<1x128x32xf32, #tpu.memory_space<vmem>>, %arg8: memref<10x10x96xf32, #tpu.memory_space<vmem>>, %arg9: memref<128x96xf32, #tpu.memory_space<vmem>>) attributes {dimension_semantics = [#tpu.dimension_semantics<parallel>], iteration_bounds = array<i64: 2>, scalar_prefetch = 0 : i64, scratch_operands = 2 : i64, tpu.core_type = #tpu.core_type<tc>, window_params = [{transform_indices = @transform_0, window_bounds = array<i64: 1, 65, 32>}, {pipeline_mode = #tpu.pipeline_mode<synchronous>, transform_indices = @transform_1, window_bounds = array<i64: 3, 3, 96>}, {pipeline_mode = #tpu.pipeline_mode<synchronous>, transform_indices = @transform_2, window_bounds = array<i64: 1, 96>}, {pipeline_mode = #tpu.pipeline_mode<synchronous>, transform_indices = @transform_3, window_bounds = array<i64: 1, 96>}, {pipeline_mode = #tpu.pipeline_mode<synchronous>, transform_indices = @transform_4, window_bounds = array<i64: 96, 128>}, {pipeline_mode = #tpu.pipeline_mode<synchronous>, transform_indices = @transform_5, window_bounds = array<i64: 1, 32>}, {transform_indices = @transform_6, window_bounds = array<i64: 1, 128, 32>}]} {
    %c0 = arith.constant 0 : index
    %c0_0 = arith.constant 0 : index
    %c0_1 = arith.constant 0 : index
    %0 = vector.load %arg1[%c0, %c0_0, %c0_1] : memref<1x65x32xf32, #tpu.memory_space<vmem>>, vector<1x65x32xf32>
    %1 = vector.shape_cast %0 : vector<1x65x32xf32> to vector<65x32xf32>
    %2 = vector.extract_strided_slice %1 {offsets = [0, 0], sizes = [1, 32], strides = [1, 1]} : vector<65x32xf32> to vector<1x32xf32>
    %3 = vector.extract_strided_slice %1 {offsets = [1, 0], sizes = [64, 32], strides = [1, 1]} : vector<65x32xf32> to vector<64x32xf32>
    %4 = vector.shape_cast %3 : vector<64x32xf32> to vector<8x8x32xf32>
    %cst = arith.constant 0.000000e+00 : f32
    %5 = vector.broadcast %cst : f32 to vector<10x10x96xf32>
    %c0_2 = arith.constant 0 : index
    %c0_3 = arith.constant 0 : index
    %c0_4 = arith.constant 0 : index
    %6 = vector.load %arg8[%c0_2, %c0_3, %c0_4] : memref<10x10x96xf32, #tpu.memory_space<vmem>>, vector<10x10x96xf32>
    tpu.vector_store %arg8[%c0_2, %c0_3, %c0_4], %5 {strides = array<i32>} : memref<10x10x96xf32, #tpu.memory_space<vmem>>, vector<10x10x96xf32>,
    %7 = tpu.concatenate %4, %4, %4 in 2 : vector<8x8x32xf32>, vector<8x8x32xf32>, vector<8x8x32xf32> -> vector<8x8x96xf32>
    %c1 = arith.constant 1 : index
    %c1_5 = arith.constant 1 : index
    %c0_6 = arith.constant 0 : index
    %8 = vector.load %arg8[%c1, %c1_5, %c0_6] : memref<10x10x96xf32, #tpu.memory_space<vmem>>, vector<8x8x96xf32>
    tpu.vector_store %arg8[%c1, %c1_5, %c0_6], %7 {strides = array<i32>} : memref<10x10x96xf32, #tpu.memory_space<vmem>>, vector<8x8x96xf32>,
    %c0_7 = arith.constant 0 : index
    %c0_8 = arith.constant 0 : index
    %c0_9 = arith.constant 0 : index
    %9 = vector.load %arg2[%c0_7, %c0_8, %c0_9] : memref<3x3x96xf32, #tpu.memory_space<vmem>>, vector<3x3x96xf32>
    %cst_10 = arith.constant 0.000000e+00 : f32
    %10 = vector.broadcast %cst_10 : f32 to vector<8x8x96xf32>
    %c0_11 = arith.constant 0 : index
    %c0_12 = arith.constant 0 : index
    %c0_13 = arith.constant 0 : index
    %11 = vector.load %arg8[%c0_11, %c0_12, %c0_13] : memref<10x10x96xf32, #tpu.memory_space<vmem>>, vector<8x8x96xf32>
    %12 = vector.extract_strided_slice %9 {offsets = [0, 0, 0], sizes = [1, 1, 96], strides = [1, 1, 1]} : vector<3x3x96xf32> to vector<1x1x96xf32>
    %13 = vector.shape_cast %12 : vector<1x1x96xf32> to vector<96xf32>
    %14 = vector.shape_cast %13 : vector<96xf32> to vector<1x1x96xf32>
    %15 = vector.broadcast %14 : vector<1x1x96xf32> to vector<8x8x96xf32>
    %16 = arith.mulf %11, %15 : vector<8x8x96xf32>
    %17 = arith.addf %10, %16 : vector<8x8x96xf32>
    %c0_14 = arith.constant 0 : index
    %c1_15 = arith.constant 1 : index
    %c0_16 = arith.constant 0 : index
    %18 = vector.load %arg8[%c0_14, %c1_15, %c0_16] : memref<10x10x96xf32, #tpu.memory_space<vmem>>, vector<8x8x96xf32>
    %19 = vector.extract_strided_slice %9 {offsets = [0, 1, 0], sizes = [1, 1, 96], strides = [1, 1, 1]} : vector<3x3x96xf32> to vector<1x1x96xf32>
    %20 = vector.shape_cast %19 : vector<1x1x96xf32> to vector<96xf32>
    %21 = vector.shape_cast %20 : vector<96xf32> to vector<1x1x96xf32>
    %22 = vector.broadcast %21 : vector<1x1x96xf32> to vector<8x8x96xf32>
    %23 = arith.mulf %18, %22 : vector<8x8x96xf32>
    %24 = arith.addf %17, %23 : vector<8x8x96xf32>
    %c0_17 = arith.constant 0 : index
    %c2 = arith.constant 2 : index
    %c0_18 = arith.constant 0 : index
    %25 = vector.load %arg8[%c0_17, %c2, %c0_18] : memref<10x10x96xf32, #tpu.memory_space<vmem>>, vector<8x8x96xf32>
    %26 = vector.extract_strided_slice %9 {offsets = [0, 2, 0], sizes = [1, 1, 96], strides = [1, 1, 1]} : vector<3x3x96xf32> to vector<1x1x96xf32>
    %27 = vector.shape_cast %26 : vector<1x1x96xf32> to vector<96xf32>
    %28 = vector.shape_cast %27 : vector<96xf32> to vector<1x1x96xf32>
    %29 = vector.broadcast %28 : vector<1x1x96xf32> to vector<8x8x96xf32>
    %30 = arith.mulf %25, %29 : vector<8x8x96xf32>
    %31 = arith.addf %24, %30 : vector<8x8x96xf32>
    %c1_19 = arith.constant 1 : index
    %c0_20 = arith.constant 0 : index
    %c0_21 = arith.constant 0 : index
    %32 = vector.load %arg8[%c1_19, %c0_20, %c0_21] : memref<10x10x96xf32, #tpu.memory_space<vmem>>, vector<8x8x96xf32>
    %33 = vector.extract_strided_slice %9 {offsets = [1, 0, 0], sizes = [1, 1, 96], strides = [1, 1, 1]} : vector<3x3x96xf32> to vector<1x1x96xf32>
    %34 = vector.shape_cast %33 : vector<1x1x96xf32> to vector<96xf32>
    %35 = vector.shape_cast %34 : vector<96xf32> to vector<1x1x96xf32>
    %36 = vector.broadcast %35 : vector<1x1x96xf32> to vector<8x8x96xf32>
    %37 = arith.mulf %32, %36 : vector<8x8x96xf32>
    %38 = arith.addf %31, %37 : vector<8x8x96xf32>
    %c1_22 = arith.constant 1 : index
    %c1_23 = arith.constant 1 : index
    %c0_24 = arith.constant 0 : index
    %39 = vector.load %arg8[%c1_22, %c1_23, %c0_24] : memref<10x10x96xf32, #tpu.memory_space<vmem>>, vector<8x8x96xf32>
    %40 = vector.extract_strided_slice %9 {offsets = [1, 1, 0], sizes = [1, 1, 96], strides = [1, 1, 1]} : vector<3x3x96xf32> to vector<1x1x96xf32>
    %41 = vector.shape_cast %40 : vector<1x1x96xf32> to vector<96xf32>
    %42 = vector.shape_cast %41 : vector<96xf32> to vector<1x1x96xf32>
    %43 = vector.broadcast %42 : vector<1x1x96xf32> to vector<8x8x96xf32>
    %44 = arith.mulf %39, %43 : vector<8x8x96xf32>
    %45 = arith.addf %38, %44 : vector<8x8x96xf32>
    %c1_25 = arith.constant 1 : index
    %c2_26 = arith.constant 2 : index
    %c0_27 = arith.constant 0 : index
    %46 = vector.load %arg8[%c1_25, %c2_26, %c0_27] : memref<10x10x96xf32, #tpu.memory_space<vmem>>, vector<8x8x96xf32>
    %47 = vector.extract_strided_slice %9 {offsets = [1, 2, 0], sizes = [1, 1, 96], strides = [1, 1, 1]} : vector<3x3x96xf32> to vector<1x1x96xf32>
    %48 = vector.shape_cast %47 : vector<1x1x96xf32> to vector<96xf32>
    %49 = vector.shape_cast %48 : vector<96xf32> to vector<1x1x96xf32>
    %50 = vector.broadcast %49 : vector<1x1x96xf32> to vector<8x8x96xf32>
    %51 = arith.mulf %46, %50 : vector<8x8x96xf32>
    %52 = arith.addf %45, %51 : vector<8x8x96xf32>
    %c2_28 = arith.constant 2 : index
    %c0_29 = arith.constant 0 : index
    %c0_30 = arith.constant 0 : index
    %53 = vector.load %arg8[%c2_28, %c0_29, %c0_30] : memref<10x10x96xf32, #tpu.memory_space<vmem>>, vector<8x8x96xf32>
    %54 = vector.extract_strided_slice %9 {offsets = [2, 0, 0], sizes = [1, 1, 96], strides = [1, 1, 1]} : vector<3x3x96xf32> to vector<1x1x96xf32>
    %55 = vector.shape_cast %54 : vector<1x1x96xf32> to vector<96xf32>
    %56 = vector.shape_cast %55 : vector<96xf32> to vector<1x1x96xf32>
    %57 = vector.broadcast %56 : vector<1x1x96xf32> to vector<8x8x96xf32>
    %58 = arith.mulf %53, %57 : vector<8x8x96xf32>
    %59 = arith.addf %52, %58 : vector<8x8x96xf32>
    %c2_31 = arith.constant 2 : index
    %c1_32 = arith.constant 1 : index
    %c0_33 = arith.constant 0 : index
    %60 = vector.load %arg8[%c2_31, %c1_32, %c0_33] : memref<10x10x96xf32, #tpu.memory_space<vmem>>, vector<8x8x96xf32>
    %61 = vector.extract_strided_slice %9 {offsets = [2, 1, 0], sizes = [1, 1, 96], strides = [1, 1, 1]} : vector<3x3x96xf32> to vector<1x1x96xf32>
    %62 = vector.shape_cast %61 : vector<1x1x96xf32> to vector<96xf32>
    %63 = vector.shape_cast %62 : vector<96xf32> to vector<1x1x96xf32>
    %64 = vector.broadcast %63 : vector<1x1x96xf32> to vector<8x8x96xf32>
    %65 = arith.mulf %60, %64 : vector<8x8x96xf32>
    %66 = arith.addf %59, %65 : vector<8x8x96xf32>
    %c2_34 = arith.constant 2 : index
    %c2_35 = arith.constant 2 : index
    %c0_36 = arith.constant 0 : index
    %67 = vector.load %arg8[%c2_34, %c2_35, %c0_36] : memref<10x10x96xf32, #tpu.memory_space<vmem>>, vector<8x8x96xf32>
    %68 = vector.extract_strided_slice %9 {offsets = [2, 2, 0], sizes = [1, 1, 96], strides = [1, 1, 1]} : vector<3x3x96xf32> to vector<1x1x96xf32>
    %69 = vector.shape_cast %68 : vector<1x1x96xf32> to vector<96xf32>
    %70 = vector.shape_cast %69 : vector<96xf32> to vector<1x1x96xf32>
    %71 = vector.broadcast %70 : vector<1x1x96xf32> to vector<8x8x96xf32>
    %72 = arith.mulf %67, %71 : vector<8x8x96xf32>
    %73 = arith.addf %66, %72 : vector<8x8x96xf32>
    %c0_37 = arith.constant 0 : index
    %c0_38 = arith.constant 0 : index
    %74 = vector.load %arg3[%c0_37, %c0_38] : memref<1x96xf32, #tpu.memory_space<vmem>>, vector<1x96xf32>
    %75 = vector.shape_cast %74 : vector<1x96xf32> to vector<96xf32>
    %76 = vector.shape_cast %75 : vector<96xf32> to vector<1x1x96xf32>
    %77 = vector.broadcast %76 : vector<1x1x96xf32> to vector<8x8x96xf32>
    %78 = arith.mulf %73, %77 : vector<8x8x96xf32>
    %c0_39 = arith.constant 0 : index
    %c0_40 = arith.constant 0 : index
    %79 = vector.load %arg4[%c0_39, %c0_40] : memref<1x96xf32, #tpu.memory_space<vmem>>, vector<1x96xf32>
    %80 = vector.shape_cast %79 : vector<1x96xf32> to vector<96xf32>
    %81 = vector.shape_cast %80 : vector<96xf32> to vector<1x1x96xf32>
    %82 = vector.broadcast %81 : vector<1x1x96xf32> to vector<8x8x96xf32>
    %83 = arith.addf %78, %82 : vector<8x8x96xf32>
    %cst_41 = arith.constant 0.000000e+00 : f32
    %84 = vector.broadcast %cst_41 : f32 to vector<128x96xf32>
    %c0_42 = arith.constant 0 : index
    %c0_43 = arith.constant 0 : index
    %85 = vector.load %arg9[%c0_42, %c0_43] : memref<128x96xf32, #tpu.memory_space<vmem>>, vector<128x96xf32>
    tpu.vector_store %arg9[%c0_42, %c0_43], %84 {strides = array<i32>} : memref<128x96xf32, #tpu.memory_space<vmem>>, vector<128x96xf32>,
    %86 = tpu.concatenate %2, %2, %2 in 1 : vector<1x32xf32>, vector<1x32xf32>, vector<1x32xf32> -> vector<1x96xf32>
    %c0_44 = arith.constant 0 : index
    %c0_45 = arith.constant 0 : index
    %87 = vector.load %arg9[%c0_44, %c0_45] : memref<128x96xf32, #tpu.memory_space<vmem>>, vector<1x96xf32>
    tpu.vector_store %arg9[%c0_44, %c0_45], %86 {strides = array<i32>} : memref<128x96xf32, #tpu.memory_space<vmem>>, vector<1x96xf32>,
    %88 = vector.shape_cast %83 : vector<8x8x96xf32> to vector<64x96xf32>
    %c1_46 = arith.constant 1 : index
    %c0_47 = arith.constant 0 : index
    %89 = vector.load %arg9[%c1_46, %c0_47] : memref<128x96xf32, #tpu.memory_space<vmem>>, vector<64x96xf32>
    tpu.vector_store %arg9[%c1_46, %c0_47], %88 {strides = array<i32>} : memref<128x96xf32, #tpu.memory_space<vmem>>, vector<64x96xf32>,
    %c0_48 = arith.constant 0 : index
    %c0_49 = arith.constant 0 : index
    %90 = vector.load %arg9[%c0_48, %c0_49] : memref<128x96xf32, #tpu.memory_space<vmem>>, vector<128x96xf32>
    %91 = arith.truncf %90 : vector<128x96xf32> to vector<128x96xbf16>
    %c0_50 = arith.constant 0 : index
    %c0_51 = arith.constant 0 : index
    %92 = vector.load %arg5[%c0_50, %c0_51] : memref<96x128xbf16, #tpu.memory_space<vmem>>, vector<96x128xbf16>
    %cst_52 = arith.constant dense<0.000000e+00> : vector<128x128xf32>
    %93 = tpu.matmul %91, %92, %cst_52 {dimension_numbers = #tpu.dot_dimension_numbers<[1], [0], [0], [1], [0, 0, 1, 1], [], []>} : vector<128x96xbf16>, vector<96x128xbf16>, vector<128x128xf32> -> vector<128x128xf32>
    %94 = tpu.iota {dimensions = array<i32: 1>} : vector<1x128xi32>
    %c65_i32 = arith.constant 65 : i32
    %95 = vector.broadcast %c65_i32 : i32 to vector<1x128xi32>
    %96 = arith.cmpi slt, %94, %95 : vector<1x128xi32>
    %cst_53 = arith.constant 0.000000e+00 : f32
    %cst_54 = arith.constant -1.000000e+30 : f32
    %97 = vector.broadcast %cst_53 : f32 to vector<1x128xf32>
    %98 = vector.broadcast %cst_54 : f32 to vector<1x128xf32>
    %99 = arith.select %96, %97, %98 : vector<1x128xi1>, vector<1x128xf32>
    %cst_55 = arith.constant 0.000000e+00 : f32
    %100 = vector.broadcast %cst_55 : f32 to vector<128x32xf32>
    %101 = vector.extract_strided_slice %93 {offsets = [0, 0], sizes = [128, 16], strides = [1, 1]} : vector<128x128xf32> to vector<128x16xf32>
    %102 = arith.truncf %101 : vector<128x16xf32> to vector<128x16xbf16>
    %103 = vector.extract_strided_slice %93 {offsets = [0, 32], sizes = [128, 16], strides = [1, 1]} : vector<128x128xf32> to vector<128x16xf32>
    %104 = arith.truncf %103 : vector<128x16xf32> to vector<128x16xbf16>
    %105 = vector.extract_strided_slice %93 {offsets = [0, 64], sizes = [128, 32], strides = [1, 1]} : vector<128x128xf32> to vector<128x32xf32>
    %106 = arith.truncf %105 : vector<128x32xf32> to vector<128x32xbf16>
    %cst_56 = arith.constant dense<0.000000e+00> : vector<128x128xf32>
    %107 = tpu.matmul %102, %104, %cst_56 {dimension_numbers = #tpu.dot_dimension_numbers<[1], [1], [0], [0], [0, 0, 1, 0], [], []>} : vector<128x16xbf16>, vector<128x16xbf16>, vector<128x128xf32> -> vector<128x128xf32>
    %108 = vector.broadcast %99 : vector<1x128xf32> to vector<128x128xf32>
    %109 = arith.addf %107, %108 : vector<128x128xf32>
    %cst_57 = arith.constant dense<0xFF800000> : vector<128xf32>
    %110 = vector.multi_reduction <maximumf>, %109, %cst_57 [1] : vector<128x128xf32> to vector<128xf32>
    %111 = vector.shape_cast %110 : vector<128xf32> to vector<128x1xf32>
    %112 = vector.broadcast %111 : vector<128x1xf32> to vector<128x128xf32>
    %113 = arith.subf %109, %112 : vector<128x128xf32>
    %114 = math.exp %113 : vector<128x128xf32>
    %cst_58 = arith.constant dense<0.000000e+00> : vector<128xf32>
    %115 = vector.multi_reduction <add>, %114, %cst_58 [1] : vector<128x128xf32> to vector<128xf32>
    %116 = vector.shape_cast %115 : vector<128xf32> to vector<128x1xf32>
    %117 = tpu.reciprocal %116 {approx = true} : vector<128x1xf32> -> vector<128x1xf32>
    %118 = vector.broadcast %117 : vector<128x1xf32> to vector<128x128xf32>
    %119 = arith.mulf %114, %118 : vector<128x128xf32>
    %120 = arith.truncf %119 : vector<128x128xf32> to vector<128x128xbf16>
    %cst_59 = arith.constant dense<0.000000e+00> : vector<128x32xf32>
    %121 = tpu.matmul %120, %106, %cst_59 {dimension_numbers = #tpu.dot_dimension_numbers<[1], [0], [0], [1], [0, 0, 1, 1], [], []>} : vector<128x128xbf16>, vector<128x32xbf16>, vector<128x32xf32> -> vector<128x32xf32>
    %122 = arith.addf %100, %121 : vector<128x32xf32>
    %123 = vector.extract_strided_slice %93 {offsets = [0, 16], sizes = [128, 16], strides = [1, 1]} : vector<128x128xf32> to vector<128x16xf32>
    %124 = arith.truncf %123 : vector<128x16xf32> to vector<128x16xbf16>
    %125 = vector.extract_strided_slice %93 {offsets = [0, 48], sizes = [128, 16], strides = [1, 1]} : vector<128x128xf32> to vector<128x16xf32>
    %126 = arith.truncf %125 : vector<128x16xf32> to vector<128x16xbf16>
    %127 = vector.extract_strided_slice %93 {offsets = [0, 96], sizes = [128, 32], strides = [1, 1]} : vector<128x128xf32> to vector<128x32xf32>
    %128 = arith.truncf %127 : vector<128x32xf32> to vector<128x32xbf16>
    %cst_60 = arith.constant dense<0.000000e+00> : vector<128x128xf32>
    %129 = tpu.matmul %124, %126, %cst_60 {dimension_numbers = #tpu.dot_dimension_numbers<[1], [1], [0], [0], [0, 0, 1, 0], [], []>} : vector<128x16xbf16>, vector<128x16xbf16>, vector<128x128xf32> -> vector<128x128xf32>
    %130 = vector.broadcast %99 : vector<1x128xf32> to vector<128x128xf32>
    %131 = arith.addf %129, %130 : vector<128x128xf32>
    %cst_61 = arith.constant dense<0xFF800000> : vector<128xf32>
    %132 = vector.multi_reduction <maximumf>, %131, %cst_61 [1] : vector<128x128xf32> to vector<128xf32>
    %133 = vector.shape_cast %132 : vector<128xf32> to vector<128x1xf32>
    %134 = vector.broadcast %133 : vector<128x1xf32> to vector<128x128xf32>
    %135 = arith.subf %131, %134 : vector<128x128xf32>
    %136 = math.exp %135 : vector<128x128xf32>
    %cst_62 = arith.constant dense<0.000000e+00> : vector<128xf32>
    %137 = vector.multi_reduction <add>, %136, %cst_62 [1] : vector<128x128xf32> to vector<128xf32>
    %138 = vector.shape_cast %137 : vector<128xf32> to vector<128x1xf32>
    %139 = tpu.reciprocal %138 {approx = true} : vector<128x1xf32> -> vector<128x1xf32>
    %140 = vector.broadcast %139 : vector<128x1xf32> to vector<128x128xf32>
    %141 = arith.mulf %136, %140 : vector<128x128xf32>
    %142 = arith.truncf %141 : vector<128x128xf32> to vector<128x128xbf16>
    %cst_63 = arith.constant dense<0.000000e+00> : vector<128x32xf32>
    %143 = tpu.matmul %142, %128, %cst_63 {dimension_numbers = #tpu.dot_dimension_numbers<[1], [0], [0], [1], [0, 0, 1, 1], [], []>} : vector<128x128xbf16>, vector<128x32xbf16>, vector<128x32xf32> -> vector<128x32xf32>
    %144 = arith.addf %122, %143 : vector<128x32xf32>
    %c0_64 = arith.constant 0 : index
    %c0_65 = arith.constant 0 : index
    %145 = vector.load %arg6[%c0_64, %c0_65] : memref<1x32xf32, #tpu.memory_space<vmem>>, vector<1x32xf32>
    %146 = vector.broadcast %145 : vector<1x32xf32> to vector<128x32xf32>
    %147 = arith.addf %144, %146 : vector<128x32xf32>
    %c0_66 = arith.constant 0 : index
    %c0_67 = arith.constant 0 : index
    %c0_68 = arith.constant 0 : index
    %148 = vector.load %arg7[%c0_66, %c0_67, %c0_68] : memref<1x128x32xf32, #tpu.memory_space<vmem>>, vector<1x128x32xf32>
    %149 = vector.shape_cast %148 : vector<1x128x32xf32> to vector<128x32xf32>
    %150 = vector.shape_cast %147 : vector<128x32xf32> to vector<1x128x32xf32>
    tpu.vector_store %arg7[%c0_66, %c0_67, %c0_68], %150 {strides = array<i32>} : memref<1x128x32xf32, #tpu.memory_space<vmem>>, vector<1x128x32xf32>,
    return
  }
  func.func @transform_0(%arg0: i32) -> (i32, i32, i32) {
    %c0_i32 = arith.constant 0 : i32
    %c0_i32_0 = arith.constant 0 : i32
    %c0_i32_1 = arith.constant 0 : i32
    return %arg0, %c0_i32, %c0_i32_0 : i32, i32, i32
  }
  func.func @transform_1(%arg0: i32) -> (i32, i32, i32) {
    %c0_i32 = arith.constant 0 : i32
    %c0_i32_0 = arith.constant 0 : i32
    %c0_i32_1 = arith.constant 0 : i32
    %c0_i32_2 = arith.constant 0 : i32
    return %c0_i32, %c0_i32_0, %c0_i32_1 : i32, i32, i32
  }
  func.func @transform_2(%arg0: i32) -> (i32, i32) {
    %c0_i32 = arith.constant 0 : i32
    %c0_i32_0 = arith.constant 0 : i32
    %c0_i32_1 = arith.constant 0 : i32
    return %c0_i32, %c0_i32_0 : i32, i32
  }
  func.func @transform_3(%arg0: i32) -> (i32, i32) {
    %c0_i32 = arith.constant 0 : i32
    %c0_i32_0 = arith.constant 0 : i32
    %c0_i32_1 = arith.constant 0 : i32
    return %c0_i32, %c0_i32_0 : i32, i32
  }
  func.func @transform_4(%arg0: i32) -> (i32, i32) {
    %c0_i32 = arith.constant 0 : i32
    %c0_i32_0 = arith.constant 0 : i32
    %c0_i32_1 = arith.constant 0 : i32
    return %c0_i32, %c0_i32_0 : i32, i32
  }
  func.func @transform_5(%arg0: i32) -> (i32, i32) {
    %c0_i32 = arith.constant 0 : i32
    %c0_i32_0 = arith.constant 0 : i32
    %c0_i32_1 = arith.constant 0 : i32
    return %c0_i32, %c0_i32_0 : i32, i32
  }
  func.func @transform_6(%arg0: i32) -> (i32, i32, i32) {
    %c0_i32 = arith.constant 0 : i32
    %c0_i32_0 = arith.constant 0 : i32
    %c0_i32_1 = arith.constant 0 : i32
    return %arg0, %c0_i32, %c0_i32_0 : i32, i32, i32
  }
}

</mosaic_0001>

<bundles_post_ra>
// kernel: tpu_custom_call.1
= control target key start
LH: loop header
LB: loop body
LE: loop exit
PB: predicated region body
PF: predicated region fallthrough
CT: control target
= control target key end

     0   :  { %s2432_s21 = smov 0   ;;  %s3334_s0 = inlined_call_operand.vmem [shape: f32[2,65,32], index: 0, kind: input, shape index: {}]   ;;  %s3335_s1 = inlined_call_operand.vmem [shape: f32[3,3,96], index: 1, kind: input, shape index: {}]   ;;  %s3336_s2 = inlined_call_operand.vmem [shape: f32[1,96], index: 2, kind: input, shape index: {}]   ;;  %s3337_s3 = inlined_call_operand.vmem [shape: f32[1,96], index: 3, kind: input, shape index: {}]   ;;  %s3338_s4 = inlined_call_operand.vmem [shape: bf16[96,128], index: 4, kind: input, shape index: {}]   ;;  %s3339_s5 = inlined_call_operand.vmem [shape: f32[1,32], index: 5, kind: input, shape index: {}]   ;;  %s3340_s6 = inlined_call_operand.vmem [shape: f32[2,128,32], index: 6, kind: output, shape index: {}]  }
   0x1 LB: > { %s1906_s22 = sadd.s32 4294967295, %s2388_s21   ;;  %p1910_p0 = scmp.ge.s32.totalorder %s2388_s21, 1  ;;  %s2388_s21 = sphi %s2432_s21, %s16_s21  }
   0x2   : > { %p212_p1 = scmp.lt.s32.totalorder %s2388_s21, 3 }
   0x4   : > { %p213_p2 = pnand %p1910_p0, %p212_p1 }
   0x5   : > { %p2442_p3 = scmp.lt.s32.totalorder (!%p213_p2), %s1906_s22, 1  ;;  %vm297_vm0 = vcmask (!%p213_p2), 785408   ;;  %vm299_vm1 = vcmask (!%p213_p2), 779264   ;;  %v2390_v0 = vmov (!%p213_p2), 0.0   ;;  %vm271_vm2 = vcmask (!%p213_p2), 1046528   ;;  %s2391_s28 = smov (!%p213_p2), 32  }
   0x6   : > { %216 = sbr.rel (%p213_p2) target bundleno = 1468 (0x5bc), region = 44  ;;  %301 = vst.msk [vmem:[#allocation2 + $0x10] sm:$0xff] (!%p213_p2), %vm297_vm0, %v2390_v0  ;;  %298 = vst.msk [vmem:[#allocation2] sm:$0xff] (!%p213_p2), %vm297_vm0, %v2390_v0  ;;  %s2392_s29 = smov (!%p213_p2), 64   ;;  %v2248_v25 = vld [vmem:[%s3338_s4] sm:$0xff] (!%p213_p2)   ;;  %v2249_v27 = vld [vmem:[%s3338_s4 + $0x8] sm:$0xff] (!%p213_p2)   ;;  %v405_v33 = vlaneseq (!%p213_p2) }
   0x7   : > { %303 = vst.msk [vmem:[#allocation2 + $0x20] sm:$0xff] (!%p213_p2), %vm297_vm0, %v2390_v0  ;;  %305 = vst.msk [vmem:[#allocation2 + $0x30] sm:$0xff] (!%p213_p2), %vm297_vm0, %v2390_v0  ;;  %2028 = vmatprep.subr.bf16.mxu0 (!%p213_p2), %v2248_v25  ;;  %v2250_v29 = vld [vmem:[%s3338_s4 + $0x10] sm:$0xff] (!%p213_p2)   ;;  %v2251_v30 = vld [vmem:[%s3338_s4 + $0x18] sm:$0xff] (!%p213_p2)   ;;  %vm367_vm3 = vcmask (!%p213_p2), 261120   ;;  %vm376_vm4 = vcmask (!%p213_p2), 523264  }
   0x8   : > { %307 = vst.msk [vmem:[#allocation2 + $0x40] sm:$0xff] (!%p213_p2), %vm297_vm0, %v2390_v0  ;;  %309 = vst.msk [vmem:[#allocation2 + $0x50] sm:$0xff] (!%p213_p2), %vm297_vm0, %v2390_v0  ;;  %2029 = vmatpush3.bf16.msra.mxu0 (!%p213_p2), %v2248_v25  ;;  %v2252_v31 = vld [vmem:[%s3338_s4 + $0x20] sm:$0xff] (!%p213_p2)   ;;  %v2253_v32 = vld [vmem:[%s3338_s4 + $0x28] sm:$0xff] (!%p213_p2)   ;;  %v406_v34 = vshrl.u32 (!%p213_p2), %v405_v33, 7  ;;  %vm704_vm5 = vcmask (!%p213_p2), 778240  }
   0x9   : > { %311 = vst.msk [vmem:[#allocation2 + $0x60] sm:$0xff] (!%p213_p2), %vm297_vm0, %v2390_v0  ;;  %313 = vst.msk [vmem:[#allocation2 + $0x70] sm:$0xff] (!%p213_p2), %vm297_vm0, %v2390_v0  ;;  %2030 = vmatprep.subr.bf16.mxu0 (!%p213_p2), %v2249_v27  ;;  %v394_v37 = vld [vmem:[%s3335_s1] sm:$0x7] (!%p213_p2)  ;;  %v395_v54 = vld [vmem:[%s3335_s1 + $0x4] sm:$0x7] (!%p213_p2) }
   0xa   : > { %315 = vst.msk [vmem:[#allocation2 + $0x80] sm:$0xff] (!%p213_p2), %vm297_vm0, %v2390_v0  ;;  %317 = vst.msk [vmem:[#allocation2 + $0x90] sm:$0xff] (!%p213_p2), %vm297_vm0, %v2390_v0  ;;  %v407_v35 = vsub.s32 (!%p213_p2), 0, %v406_v34  ;;  %v435_v36 = vsub.s32 (!%p213_p2), 1, %v406_v34  ;;  %v463_v42 = vsub.s32 (!%p213_p2), 2, %v406_v34  ;;  %vm943_vm6 = vcmask (!%p213_p2), 130048  }
   0xb   : > { %680 = vst.msk [vmem:[#allocation3] sm:$0xff] (!%p213_p2), %vm297_vm0, %v2390_v0  ;;  %681 = vst.msk [vmem:[#allocation3 + $0x8] sm:$0xff] (!%p213_p2), %vm297_vm0, %v2390_v0  ;;  %v396_v60 = vld [vmem:[%s3335_s1 + $0x8] sm:$0x7] (!%p213_p2)  ;;  %s2393_s8 = smov (!%p213_p2), 80   ;;  %s2394_s9 = smov (!%p213_p2), 96  }
   0xc   : > { %682 = vst.msk [vmem:[#allocation3 + $0x10] sm:$0xff] (!%p213_p2), %vm297_vm0, %v2390_v0  ;;  %683 = vst.msk [vmem:[#allocation3 + $0x18] sm:$0xff] (!%p213_p2), %vm297_vm0, %v2390_v0  ;;  %2031 = vmatpush3.bf16.msra.mxu0 (!%p213_p2), %v2249_v27  ;;  %v2588_v40 = vrot.slane (!%p213_p2), %v394_v37, %v407_v35  ;;  %v2590_v41 = vrot.slane (!%p213_p2), %v394_v37, %v435_v36  ;;  %v2595_v49 = vrot.slane (!%p213_p2), %v394_v37, %v463_v42  ;;  %s2395_s10 = smov (!%p213_p2), 112  }
   0xd   : > { %684 = vst.msk [vmem:[#allocation3 + $0x20] sm:$0xff] %vm297_vm0, %v2390_v0  ;;  %685 = vst.msk [vmem:[#allocation3 + $0x28] sm:$0xff] %vm297_vm0, %v2390_v0  ;;  %s3343_s22 = smov (!%p2442_p3, %s1906_s22), 1  ;;  %2032 = vmatprep.subr.bf16.mxu0 %v2250_v29  ;;  %v397_v43 = vld [vmem:[#allocation2] sm:$0xff]  ;;  %v2614_v63 = vrot.slane %v395_v54, %v407_v35 }
   0xe   : > { %686 = vst.msk [vmem:[#allocation3 + $0x30] sm:$0xff] %vm297_vm0, %v2390_v0  ;;  %687 = vst.msk [vmem:[#allocation3 + $0x38] sm:$0xff] %vm297_vm0, %v2390_v0  ;;  %s2232_s24 = smul.u32 72, %s3343_s22  ;;  %v409_v50 = vmul.f32 %v2588_v40, %v397_v43 }
   0xf   : > { %688 = vst.msk [vmem:[#allocation3 + $0x40] sm:$0xff] %vm297_vm0, %v2390_v0  ;;  %689 = vst.msk [vmem:[#allocation3 + $0x48] sm:$0xff] %vm297_vm0, %v2390_v0 }
  0x10   : > { %690 = vst.msk [vmem:[#allocation3 + $0x50] sm:$0xff] %vm297_vm0, %v2390_v0  ;;  %691 = vst.msk [vmem:[#allocation3 + $0x58] sm:$0xff] %vm297_vm0, %v2390_v0  ;;  %s2492_s27 = scalar_lea.vmem %s3334_s0, %s2232_s24  ;;  %2033 = vmatpush3.bf16.msra.mxu0 %v2250_v29 }
  0x11   : > { %692 = vst.msk [vmem:[#allocation3 + $0x60] sm:$0xff] %vm297_vm0, %v2390_v0  ;;  %693 = vst.msk [vmem:[#allocation3 + $0x68] sm:$0xff] %vm297_vm0, %v2390_v0  ;;  %v255_v1 = vld [vmem:[%s2492_s27 + $0x10] sm:$0xff]  ;;  %v256_v2 = vld [vmem:[%s2492_s27 + $0x18] sm:$0xff]  ;;  %2034 = vmatprep.subr.bf16.mxu0 %v2251_v30 }
  0x12   : > { %694 = vst.msk [vmem:[#allocation3 + $0x70] sm:$0xff] %vm297_vm0, %v2390_v0  ;;  %695 = vst.msk [vmem:[#allocation3 + $0x78] sm:$0xff] %vm297_vm0, %v2390_v0  ;;  %v2497_v3 = vld [vmem:[%s2492_s27] sm:$0xff]  ;;  %v275_v4 = vrot.slane %v255_v1, 1  ;;  %v277_v5 = vrot.slane %v256_v2, 1  ;;  %v254_v6 = vld [vmem:[%s2492_s27 + $0x8] sm:$0xff] }
  0x13   : > { %300 = vst.msk [vmem:[#allocation2 + $0x8] sm:$0x3] %vm299_vm1, %v2390_v0  ;;  %302 = vst.msk [vmem:[#allocation2 + $0x18] sm:$0x3] %vm299_vm1, %v2390_v0  ;;  %v272_v7 = vrot.slane %v2497_v3, 1  ;;  %v273_v8 = vrot.slane %v254_v6, 1  ;;  %v2621_v6 = vrot.slane %v396_v60, %v407_v35 }
  0x14   : > { %318 = vst.msk [vmem:[#allocation2 + $0x98] sm:$0x3] %vm299_vm1, %v2390_v0  ;;  %304 = vst.msk [vmem:[#allocation2 + $0x28] sm:$0x3] %vm299_vm1, %v2390_v0  ;;  %v2502_v9 = vsel %vm271_vm2, %v275_v4, %v277_v5  ;;  %v257_v12 = vld [vmem:[%s2492_s27 + $0x20] sm:$0xff]  ;;  %v258_v14 = vld [vmem:[%s2492_s27 + $0x28] sm:$0xff]  ;;  %2035 = vmatpush3.bf16.msra.mxu0 %v2251_v30 }
  0x15   : > { %306 = vst.msk [vmem:[#allocation2 + $0x38] sm:$0x3] %vm299_vm1, %v2390_v0  ;;  %308 = vst.msk [vmem:[#allocation2 + $0x48] sm:$0x3] %vm299_vm1, %v2390_v0  ;;  %323 = vrot.lane.b32.xlu1 %v2502_v9, %s2391_s28  ;;  %v2507_v10 = vsel %vm271_vm2, %v272_v7, %v273_v8  ;;  %v2512_v11 = vsel %vm271_vm2, %v273_v8, %v275_v4  ;;  %v279_v13 = vrot.slane %v257_v12, 1  ;;  %v281_v16 = vrot.slane %v258_v14, 1 }
  0x16   : > { %310 = vst.msk [vmem:[#allocation2 + $0x58] sm:$0x3] %vm299_vm1, %v2390_v0  ;;  %312 = vst.msk [vmem:[#allocation2 + $0x68] sm:$0x3] %vm299_vm1, %v2390_v0  ;;  %319 = vrot.lane.b32.xlu0 %v2507_v10, %s2391_s28  ;;  %v259_v17 = vld [vmem:[%s2492_s27 + $0x30] sm:$0xff]  ;;  %v260_v18 = vld [vmem:[%s2492_s27 + $0x38] sm:$0xff]  ;;  %2036 = vmatprep.subr.bf16.mxu0 %v2252_v31  ;;  %v2617_v4 = vrot.slane %v395_v54, %v435_v36 }
  0x17   : > { %314 = vst.msk [vmem:[#allocation2 + $0x78] sm:$0x3] %vm299_vm1, %v2390_v0  ;;  %316 = vst.msk [vmem:[#allocation2 + $0x88] sm:$0x3] %vm299_vm1, %v2390_v0  ;;  %v2525_v15 = vsel %vm271_vm2, %v277_v5, %v279_v13  ;;  %v2534_v19 = vsel %vm271_vm2, %v279_v13, %v281_v16  ;;  %v283_v20 = vrot.slane %v259_v17, 1  ;;  %v285_v21 = vrot.slane %v260_v18, 1 }
  0x18   : > { %v261_v24 = vld [vmem:[%s2492_s27 + $0x40] sm:$0x1]  ;;  %2037 = vmatpush3.bf16.msra.mxu0 %v2252_v31  ;;  %v2619_v5 = vrot.slane %v395_v54, %v463_v42  ;;  %v573_v8 = vld [vmem:[#allocation2 + $0x90] sm:$0xff]  ;;  %v2627_v17 = vrot.slane %v396_v60, %v435_v36 }
  0x19   : > { %343 = vrot.lane.b32.xlu1 %v2507_v10, %s2392_s29  ;;  %v2541_v22 = vsel %vm271_vm2, %v283_v20, %v285_v21  ;;  %v2544_v23 = vsel %vm271_vm2, %v281_v16, %v283_v20  ;;  %v287_v26 = vrot.slane %v261_v24, 1  ;;  %2038 = vmatprep.subr.bf16.mxu0 %v2253_v32  ;;  %v2630_v20 = vrot.slane %v396_v60, %v463_v42 }
  0x1a   : > { %321 = vrot.lane.b32.xlu0 %v2512_v11, %s2391_s28  ;;  %v425_v44 = vld [vmem:[#allocation2 + $0x1] sm:$0xff] }
  0x1b   : > { %v2562_v28 = vsel %vm271_vm2, %v285_v21, %v287_v26  ;;  %v437_v51 = vmul.f32 %v2590_v41, %v425_v44  ;;  %v453_v52 = vld [vmem:[#allocation2 + $0x2] sm:$0xff]  ;;  %v601_v13 = vld [vmem:[#allocation2 + $0x91] sm:$0xff]  ;;  %v2635_v26 = vmul.f32 %v2621_v6, %v573_v8 }
  0x1c   : > { %2039 = vmatpush3.bf16.msra.mxu0 %v2253_v32  ;;  %v465_v62 = vmul.f32 %v2595_v49, %v453_v52  ;;  %v629_v14 = vld [vmem:[#allocation2 + $0x92] sm:$0xff]  ;;  %v2639_v32 = vmul.f32 %v2627_v17, %v601_v13 }
  0x1d   : > { %347 = vrot.lane.b32.xlu1 %v2502_v9, %s2392_s29  ;;  %v445_v61 = vadd.f32 %v437_v51, %v409_v50  ;;  %v2642_v34 = vmul.f32 %v2630_v20, %v629_v14 }
  0x1e   : > { %345 = vrot.lane.b32.xlu0 %v2512_v11, %s2392_s29 }
  0x1f   : > { %v473_v16 = vadd.f32 %v465_v62, %v445_v61 }
  0x21   : > { %349 = vrot.lane.b32.xlu1 %v2525_v15, %s2392_s29 }
  0x22   : > { %325 = vrot.lane.b32.xlu0 %v2525_v15, %s2391_s28 }
  0x25   : > { %351 = vrot.lane.b32.xlu1 %v2534_v19, %s2392_s29 }
  0x26   : > { %327 = vrot.lane.b32.xlu0 %v2534_v19, %s2391_s28 }
  0x29   : > { %331 = vrot.lane.b32.xlu1 %v2541_v22, %s2391_s28 }
  0x2a   : > { %329 = vrot.lane.b32.xlu0 %v2544_v23, %s2391_s28 }
  0x2d   : > { %355 = vrot.lane.b32.xlu1 %v2541_v22, %s2392_s29 }
  0x2e   : > { %353 = vrot.lane.b32.xlu0 %v2544_v23, %s2392_s29 }
  0x31   : > { %357 = vrot.lane.b32.xlu1 %v2562_v28, %s2392_s29 }
  0x32   : > { %333 = vrot.lane.b32.xlu0 %v2562_v28, %s2391_s28 }
  0x35   : > { %699 = vrot.lane.b32.xlu1 %v2497_v3, %s2392_s29 }
  0x36   : > { %696 = vrot.lane.b32.xlu0 %v2497_v3, %s2391_s28 }
  0x87   : > { %v324_v38 = vpop.permute.xlu1 %323 }
  0x88   : > { %v320_v39 = vpop.permute.xlu0 %319  ;;  %v370_v53 = vsel %vm367_vm3, %v2502_v9, %v324_v38 }
  0x89   : > { %v368_v45 = vsel %vm367_vm3, %v2507_v10, %v320_v39 }
  0x8b   : > { %v344_v46 = vpop.permute.xlu1 %343 }
  0x8c   : > { %v377_v47 = vsel %vm376_vm4, %v368_v45, %v344_v46  ;;  %v322_v48 = vpop.permute.xlu0 %321 }
  0x8d   : > { %386 = vst.msk [vmem:[#allocation2 + $0x11] sm:$0xff] %vm297_vm0, %v377_v47  ;;  %v369_v56 = vsel %vm367_vm3, %v2512_v11, %v322_v48 }
  0x8f   : > { %v348_v55 = vpop.permute.xlu1 %347 }
  0x90   : > { %v379_v57 = vsel %vm376_vm4, %v370_v53, %v348_v55  ;;  %v346_v58 = vpop.permute.xlu0 %345 }
  0x91   : > { %388 = vst.msk [vmem:[#allocation2 + $0x31] sm:$0xff] %vm297_vm0, %v379_v57  ;;  %v378_v59 = vsel %vm376_vm4, %v369_v56, %v346_v58 }
  0x92   : > { %387 = vst.msk [vmem:[#allocation2 + $0x21] sm:$0xff] %vm297_vm0, %v378_v59 }
  0x93   : > { %v350_v0 = vpop.permute.xlu1 %349 }
  0x94   : > { %v398_v1 = vld [vmem:[#allocation2 + $0x10] sm:$0xff]  ;;  %v326_v7 = vpop.permute.xlu0 %325 }
  0x95   : > { %v426_v2 = vld [vmem:[#allocation2 + $0x11] sm:$0xff]  ;;  %v410_v9 = vmul.f32 %v2588_v40, %v398_v1  ;;  %v371_v12 = vsel %vm367_vm3, %v2525_v15, %v326_v7  ;;  %v493_v21 = vmul.f32 %v2614_v63, %v398_v1 }
  0x96   : > { %v438_v10 = vmul.f32 %v2590_v41, %v426_v2  ;;  %v454_v11 = vld [vmem:[#allocation2 + $0x12] sm:$0xff]  ;;  %v380_v18 = vsel %vm376_vm4, %v371_v12, %v350_v0  ;;  %v521_v35 = vmul.f32 %v2617_v4, %v426_v2 }
  0x97   : > { %389 = vst.msk [vmem:[#allocation2 + $0x41] sm:$0xff] %vm297_vm0, %v380_v18  ;;  %v352_v25 = vpop.permute.xlu1 %351  ;;  %v466_v15 = vmul.f32 %v2595_v49, %v454_v11  ;;  %v501_v43 = vadd.f32 %v493_v21, %v473_v16  ;;  %v549_v44 = vmul.f32 %v2619_v5, %v454_v11 }
  0x98   : > { %v446_v24 = vadd.f32 %v438_v10, %v410_v9  ;;  %v400_v27 = vld [vmem:[#allocation2 + $0x30] sm:$0xff]  ;;  %v328_v31 = vpop.permute.xlu0 %327 }
  0x99   : > { %v428_v29 = vld [vmem:[#allocation2 + $0x31] sm:$0xff]  ;;  %v412_v36 = vmul.f32 %v2588_v40, %v400_v27  ;;  %v399_v38 = vld [vmem:[#allocation2 + $0x20] sm:$0xff]  ;;  %v495_v47 = vmul.f32 %v2614_v63, %v400_v27  ;;  %v372_v58 = vsel %vm367_vm3, %v2534_v19, %v328_v31  ;;  %v2670_v0 = vmul.f32 %v2621_v6, %v400_v27 }
  0x9a   : > { %v456_v30 = vld [vmem:[#allocation2 + $0x32] sm:$0xff]  ;;  %v440_v37 = vmul.f32 %v2590_v41, %v428_v29  ;;  %v2647_v39 = vld [vmem:[#allocation2 + $0x21] sm:$0xff]  ;;  %v474_v45 = vadd.f32 %v466_v15, %v446_v24  ;;  %v411_v48 = vmul.f32 %v2588_v40, %v399_v38  ;;  %v523_v51 = vmul.f32 %v2617_v4, %v428_v29 }
  0x9b   : > { %v2649_v42 = vld [vmem:[#allocation2 + $0x22] sm:$0xff]  ;;  %v468_v46 = vmul.f32 %v2595_v49, %v456_v30  ;;  %v439_v52 = vmul.f32 %v2590_v41, %v2647_v39  ;;  %v494_v53 = vmul.f32 %v2614_v63, %v399_v38  ;;  %v332_v54 = vpop.permute.xlu1 %331  ;;  %v551_v55 = vmul.f32 %v2619_v5, %v456_v30 }
  0x9c   : > { %v448_v50 = vadd.f32 %v440_v37, %v412_v36  ;;  %v467_v56 = vmul.f32 %v2595_v49, %v2649_v42  ;;  %v522_v57 = vmul.f32 %v2617_v4, %v2647_v39  ;;  %v330_v59 = vpop.permute.xlu0 %329  ;;  %v381_v61 = vsel %vm376_vm4, %v372_v58, %v352_v25 }
  0x9d   : > { %v447_v60 = vadd.f32 %v439_v52, %v411_v48  ;;  %v374_v62 = vsel %vm367_vm3, %v2541_v22, %v332_v54  ;;  %390 = vst.msk [vmem:[#allocation2 + $0x51] sm:$0xff] %vm297_vm0, %v381_v61  ;;  %v373_v9 = vsel %vm367_vm3, %v2544_v23, %v330_v59  ;;  %v2676_v19 = vmul.f32 %v2627_v17, %v428_v29 }
  0x9e   : > { %v476_v1 = vadd.f32 %v468_v46, %v448_v50  ;;  %v401_v2 = vld [vmem:[#allocation2 + $0x40] sm:$0xff]  ;;  %v502_v10 = vadd.f32 %v494_v53, %v474_v45  ;;  %v529_v14 = vadd.f32 %v521_v35, %v501_v43  ;;  %v2684_v23 = vmul.f32 %v2630_v20, %v456_v30 }
  0x9f   : > { %v429_v7 = vld [vmem:[#allocation2 + $0x41] sm:$0xff]  ;;  %v475_v11 = vadd.f32 %v467_v56, %v447_v60  ;;  %v413_v12 = vmul.f32 %v2588_v40, %v401_v2  ;;  %v356_v13 = vpop.permute.xlu1 %355  ;;  %v496_v18 = vmul.f32 %v2614_v63, %v401_v2  ;;  %v550_v37 = vmul.f32 %v2619_v5, %v2649_v42 }
  0xa0   : > { %v457_v8 = vld [vmem:[#allocation2 + $0x42] sm:$0xff]  ;;  %v441_v22 = vmul.f32 %v2590_v41, %v429_v7  ;;  %v524_v21 = vmul.f32 %v2617_v4, %v429_v7  ;;  %v354_v24 = vpop.permute.xlu0 %353  ;;  %v383_v29 = vsel %vm376_vm4, %v374_v62, %v356_v13  ;;  %v530_v36 = vadd.f32 %v522_v57, %v502_v10 }
  0xa1   : > { %v469_v16 = vmul.f32 %v2595_v49, %v457_v8  ;;  %v503_v25 = vadd.f32 %v495_v47, %v475_v11  ;;  %v552_v27 = vmul.f32 %v2619_v5, %v457_v8  ;;  %v504_v31 = vadd.f32 %v496_v18, %v476_v1  ;;  %392 = vst.msk [vmem:[#allocation2 + $0x71] sm:$0xff] %vm297_vm0, %v383_v29 }
  0xa2   : > { %v449_v15 = vadd.f32 %v441_v22, %v413_v12  ;;  %v382_v35 = vsel %vm376_vm4, %v373_v9, %v354_v24  ;;  %v2693_v45 = vmul.f32 %v2621_v6, %v401_v2  ;;  %v2696_v30 = vmul.f32 %v2627_v17, %v429_v7 }
  0xa3   : > { %v531_v43 = vadd.f32 %v523_v51, %v503_v25  ;;  %391 = vst.msk [vmem:[#allocation2 + $0x61] sm:$0xff] %vm297_vm0, %v382_v35  ;;  %v557_v46 = vadd.f32 %v549_v44, %v529_v14  ;;  %v532_v48 = vadd.f32 %v524_v21, %v504_v31  ;;  %v558_v52 = vadd.f32 %v550_v37, %v530_v36  ;;  %v358_v58 = vpop.permute.xlu1 %357 }
  0xa4   : > { %v477_v47 = vadd.f32 %v469_v16, %v449_v15  ;;  %v334_v50 = vpop.permute.xlu0 %333  ;;  %v578_v53 = vmul.f32 %v2621_v6, %v399_v38  ;;  %v402_v54 = vld [vmem:[#allocation2 + $0x50] sm:$0xff]  ;;  %v2704_v60 = vmul.f32 %v2627_v17, %v2647_v39  ;;  %v2708_v44 = vmul.f32 %v2630_v20, %v2649_v42 }
  0xa5   : > { %v430_v56 = vld [vmem:[#allocation2 + $0x51] sm:$0xff]  ;;  %v375_v51 = vsel %vm367_vm3, %v2562_v28, %v334_v50  ;;  %v559_v59 = vadd.f32 %v551_v55, %v531_v43  ;;  %v560_v61 = vadd.f32 %v552_v27, %v532_v48  ;;  %v414_v62 = vmul.f32 %v2588_v40, %v402_v54 }
  0xa6   : > { %v458_v57 = vld [vmem:[#allocation2 + $0x52] sm:$0xff]  ;;  %v442_v38 = vmul.f32 %v2590_v41, %v430_v56  ;;  %v2712_v1 = vadd.f32 %v578_v53, %v557_v46  ;;  %v497_v28 = vmul.f32 %v2614_v63, %v402_v54  ;;  %v581_v55 = vmul.f32 %v2621_v6, %v402_v54 }
  0xa7   : > { %v470_v2 = vmul.f32 %v2595_v49, %v458_v57  ;;  %v2718_v39 = vmul.f32 %v2630_v20, %v457_v8  ;;  %v525_v42 = vmul.f32 %v2617_v4, %v430_v56  ;;  %v553_v9 = vmul.f32 %v2619_v5, %v458_v57 }
  0xa8   : > { %v450_v7 = vadd.f32 %v442_v38, %v414_v62  ;;  %v384_v10 = vsel %vm376_vm4, %v375_v51, %v358_v58  ;;  %v697_v11 = vpop.permute.xlu0 %696  ;;  %v505_v12 = vadd.f32 %v497_v28, %v477_v47  ;;  %v589_v22 = vadd.f32 %v581_v55, %v560_v61  ;;  %v404_v16 = vld [vmem:[#allocation2 + $0x70] sm:$0xff] }
  0xa9   : > { %v609_v13 = vmul.f32 %v2627_v17, %v430_v56  ;;  %v637_v14 = vmul.f32 %v2630_v20, %v458_v57  ;;  %v432_v18 = vld [vmem:[#allocation2 + $0x71] sm:$0xff]  ;;  %393 = vst.msk [vmem:[#allocation2 + $0x81] sm:$0xff] %vm297_vm0, %v384_v10  ;;  %v416_v8 = vmul.f32 %v2588_v40, %v404_v16  ;;  %v2730_v15 = vsel %vm367_vm3, %v2497_v3, %v697_v11 }
  0xaa   : > { %v460_v21 = vld [vmem:[#allocation2 + $0x72] sm:$0xff]  ;;  %v444_v24 = vmul.f32 %v2590_v41, %v432_v18  ;;  %v403_v25 = vld [vmem:[#allocation2 + $0x60] sm:$0xff]  ;;  %v587_v27 = vadd.f32 %v2670_v0, %v558_v52  ;;  %v533_v29 = vadd.f32 %v525_v42, %v505_v12  ;;  %v499_v36 = vmul.f32 %v2614_v63, %v404_v16 }
  0xab   : > { %v617_v31 = vadd.f32 %v609_v13, %v589_v22  ;;  %v472_v35 = vmul.f32 %v2595_v49, %v460_v21  ;;  %v431_v37 = vld [vmem:[#allocation2 + $0x61] sm:$0xff]  ;;  %v527_v46 = vmul.f32 %v2617_v4, %v432_v18  ;;  %v555_v47 = vmul.f32 %v2619_v5, %v460_v21 }
  0xac   : > { %v452_v43 = vadd.f32 %v444_v24, %v416_v8  ;;  %v583_v48 = vmul.f32 %v2621_v6, %v404_v16  ;;  %v459_v50 = vld [vmem:[#allocation2 + $0x62] sm:$0xff]  ;;  %v611_v3 = vmul.f32 %v2627_v17, %v432_v18  ;;  %v639_v53 = vmul.f32 %v2630_v20, %v460_v21  ;;  %v1914_v24 = vld [vmem:[%s3336_s2] ss:$0 sm:$0xff] }
  0xad   : > { %v561_v0 = vadd.f32 %v553_v9, %v533_v29  ;;  %v415_v52 = vmul.f32 %v2588_v40, %v403_v25  ;;  %v645_v54 = vadd.f32 %v637_v14, %v617_v31  ;;  %v478_v56 = vadd.f32 %v470_v2, %v450_v7 }
  0xae   : > { %v443_v57 = vmul.f32 %v2590_v41, %v431_v37  ;;  %v498_v51 = vmul.f32 %v2614_v63, %v403_v25  ;;  %v480_v58 = vadd.f32 %v472_v35, %v452_v43  ;;  %v471_v61 = vmul.f32 %v2595_v49, %v459_v50 }
  0xaf   : > { %v526_v62 = vmul.f32 %v2617_v4, %v431_v37  ;;  %v582_v38 = vmul.f32 %v2621_v6, %v403_v25  ;;  %v554_v42 = vmul.f32 %v2619_v5, %v459_v50  ;;  %v588_v2 = vadd.f32 %v2693_v45, %v559_v59 }
  0xb0   : > { %v451_v28 = vadd.f32 %v443_v57, %v415_v52  ;;  %v506_v55 = vadd.f32 %v498_v51, %v478_v56  ;;  %v488_v9 = vld [vmem:[#allocation2 + $0x80] sm:$0xff]  ;;  %v610_v41 = vmul.f32 %v2627_v17, %v431_v37  ;;  %v638_v11 = vmul.f32 %v2630_v20, %v459_v50 }
  0xb1   : > { %v516_v40 = vld [vmem:[#allocation2 + $0x81] sm:$0xff]  ;;  %v590_v7 = vadd.f32 %v582_v38, %v561_v0  ;;  %v500_v49 = vmul.f32 %v2614_v63, %v488_v9  ;;  %v584_v21 = vmul.f32 %v2621_v6, %v488_v9  ;;  %v614_v45 = vadd.f32 %v2704_v60, %v2712_v1  ;;  %v700_v63 = vpop.permute.xlu1 %699  ;;  %v1915_v60 = vld [vmem:[%s3337_s3] ss:$0 sm:$0xff] }
  0xb2   : > { %v544_v10 = vld [vmem:[#allocation2 + $0x82] sm:$0xff]  ;;  %v479_v12 = vadd.f32 %v471_v61, %v451_v28  ;;  %v534_v22 = vadd.f32 %v526_v62, %v506_v55  ;;  %v528_v13 = vmul.f32 %v2617_v4, %v516_v40  ;;  %v615_v25 = vadd.f32 %v2676_v19, %v587_v27 }
  0xb3   : > { %v556_v14 = vmul.f32 %v2619_v5, %v544_v10  ;;  %v618_v16 = vadd.f32 %v610_v41, %v590_v7  ;;  %v508_v18 = vadd.f32 %v500_v49, %v480_v58  ;;  %v616_v4 = vadd.f32 %v2696_v30, %v588_v2  ;;  %v723_v41 = vld [vmem:[#allocation3 + $0x48] sm:$0xff] }
  0xb4   : > { %v507_v59 = vadd.f32 %v499_v36, %v479_v12  ;;  %v562_v8 = vadd.f32 %v554_v42, %v534_v22  ;;  %v642_v31 = vadd.f32 %v2708_v44, %v614_v45  ;;  %v660_v35 = vmul.f32 %v1914_v24, %v645_v54 }
  0xb5   : > { %v646_v29 = vadd.f32 %v638_v11, %v618_v16  ;;  %v536_v5 = vadd.f32 %v528_v13, %v508_v18  ;;  %v643_v1 = vadd.f32 %v2684_v23, %v615_v25  ;;  %v644_v36 = vadd.f32 %v2718_v39, %v616_v4  ;;  %v725_v16 = vld [vmem:[#allocation3 + $0x58] sm:$0xff]  ;;  %v726_v18 = vld [vmem:[#allocation3 + $0x60] sm:$0xff] }
  0xb6   : > { %v591_v6 = vadd.f32 %v583_v48, %v562_v8  ;;  %v535_v37 = vadd.f32 %v527_v46, %v507_v59  ;;  %v657_v50 = vmul.f32 %v1914_v24, %v642_v31  ;;  %v675_v19 = vadd.f32 %v1915_v60, %v660_v35  ;;  %v728_v8 = vld [vmem:[#allocation3 + $0x70] sm:$0xff] }
  0xb7   : > { %v564_v43 = vadd.f32 %v556_v14, %v536_v5  ;;  %v703_v30 = vsel %vm376_vm4, %v2730_v15, %v700_v63  ;;  %v658_v44 = vmul.f32 %v1914_v24, %v643_v1  ;;  %v659_v52 = vmul.f32 %v1914_v24, %v644_v36  ;;  %v724_v14 = vld [vmem:[#allocation3 + $0x50] sm:$0xff] }
  0xb8   : > { %v619_v27 = vadd.f32 %v611_v3, %v591_v6  ;;  %v563_v0 = vadd.f32 %v555_v47, %v535_v37  ;;  %705 = vst.msk [vmem:[#allocation3] sm:$0x1] %vm704_vm5, %v703_v30  ;;  %v612_v48 = vmul.f32 %v2627_v17, %v516_v40  ;;  %v672_v54 = vadd.f32 %v1915_v60, %v657_v50 }
  0xb9   : > { %v593_v46 = vadd.f32 %v2635_v26, %v564_v43  ;;  %709 = vst.msk [vmem:[#allocation3 + $0x19] sm:$0xff] %vm297_vm0, %v675_v19  ;;  %v661_v23 = vmul.f32 %v1914_v24, %v646_v29  ;;  %v673_v57 = vadd.f32 %v1915_v60, %v658_v44  ;;  %v674_v51 = vadd.f32 %v1915_v60, %v659_v52 }
  0xba   : > { %v647_v39 = vadd.f32 %v639_v53, %v619_v27  ;;  %v592_v56 = vadd.f32 %v584_v21, %v563_v0  ;;  %706 = vst.msk [vmem:[#allocation3 + $0x1] sm:$0xff] %vm297_vm0, %v672_v54  ;;  %v640_v58 = vmul.f32 %v2630_v20, %v544_v10  ;;  %v727_v21 = vld [vmem:[#allocation3 + $0x68] sm:$0xff]  ;;  %v735_v45 = vpack.c.bf16 %v725_v16, %v724_v14 }
  0xbb   : > { %v621_v15 = vadd.f32 %v2639_v32, %v593_v46  ;;  %v676_v47 = vadd.f32 %v1915_v60, %v661_v23  ;;  %707 = vst.msk [vmem:[#allocation3 + $0x9] sm:$0xff] %vm297_vm0, %v673_v57  ;;  %708 = vst.msk [vmem:[#allocation3 + $0x11] sm:$0xff] %vm297_vm0, %v674_v51  ;;  %v736_v59 = vpack.c.bf16 %v727_v21, %v726_v18 }
  0xbc   : > { %v620_v3 = vadd.f32 %v612_v48, %v592_v56  ;;  %v662_v17 = vmul.f32 %v1914_v24, %v647_v39 }
  0xbd   : > { %v649_v26 = vadd.f32 %v2642_v34, %v621_v15  ;;  %710 = vst.msk [vmem:[#allocation3 + $0x21] sm:$0xff] %vm297_vm0, %v676_v47 }
  0xbe   : > { %v648_v53 = vadd.f32 %v640_v58, %v620_v3  ;;  %v677_v61 = vadd.f32 %v1915_v60, %v662_v17 }
  0xbf   : > { %v664_v62 = vmul.f32 %v1914_v24, %v649_v26 }
  0xc0   : > { %711 = vst.msk [vmem:[#allocation3 + $0x29] sm:$0xff] %vm297_vm0, %v677_v61  ;;  %v663_v32 = vmul.f32 %v1914_v24, %v648_v53  ;;  %v729_v24 = vld [vmem:[#allocation3 + $0x78] sm:$0xff] }
  0xc1   : > { %v679_v38 = vadd.f32 %v1915_v60, %v664_v62  ;;  %v714_v28 = vld [vmem:[#allocation3] sm:$0xff]  ;;  %v737_v63 = vpack.c.bf16 %v729_v24, %v728_v8 }
  0xc2   : > { %v678_v55 = vadd.f32 %v1915_v60, %v663_v32  ;;  %v715_v42 = vld [vmem:[#allocation3 + $0x8] sm:$0xff]  ;;  %v716_v20 = vld [vmem:[#allocation3 + $0x10] sm:$0xff]  ;;  %v717_v9 = vld [vmem:[#allocation3 + $0x18] sm:$0xff] }
  0xc3   : > { %713 = vst.msk [vmem:[#allocation3 + $0x39] sm:$0xff] %vm297_vm0, %v679_v38  ;;  %v730_v40 = vpack.c.bf16 %v715_v42, %v714_v28  ;;  %v731_v10 = vpack.c.bf16 %v717_v9, %v716_v20 }
  0xc4   : > { %712 = vst.msk [vmem:[#allocation3 + $0x31] sm:$0xff] %vm297_vm0, %v678_v55  ;;  %v718_v34 = vld [vmem:[#allocation3 + $0x20] sm:$0xff] }
  0xc5   : > { %2040 = vmatprep.mubr.msk.bf16.mxu0 %vm297_vm0, %v730_v40 }
  0xc6   : > { %2041 = vmatmul.mubr.msk.bf16.vlgmr.msra.gmra.mrb[0].mxu0 %vm297_vm0, %v731_v10 }
  0xc7   : > { %v719_v2 = vld [vmem:[#allocation3 + $0x28] sm:$0xff] }
  0xc8   : > { %v732_v7 = vpack.c.bf16 %v719_v2, %v718_v34 }
  0xca   : > { %2044 = vmatprep.mubr.msk.bf16.mxu0 %vm297_vm0, %v732_v7  ;;  %v722_v11 = vld [vmem:[#allocation3 + $0x40] sm:$0xff] }
  0xcb   : > { %v720_v49 = vld [vmem:[#allocation3 + $0x30] sm:$0xff]  ;;  %v721_v12 = vld [vmem:[#allocation3 + $0x38] sm:$0xff]  ;;  %v734_v13 = vpack.c.bf16 %v723_v41, %v722_v11 }
  0xcc   : > { %v733_v22 = vpack.c.bf16 %v721_v12, %v720_v49 }
  0xce   : > { %2045 = vmatmul.mubr.msk.bf16.gmra.mrb[4].mxu0 %vm297_vm0, %v733_v22 }
  0xcf   : > { %2048 = vmatprep.mubr.msk.bf16.mxu0 %vm297_vm0, %v734_v13 }
  0xd6   : > { %2049 = vmatmul.mubr.msk.bf16.gmra.mrb[8].mxu0 %vm297_vm0, %v735_v45 }
  0xd7   : > { %2052 = vmatprep.mubr.msk.bf16.mxu0 %vm297_vm0, %v736_v59 }
  0xde   : > { %2053 = vmatmul.mubr.msk.bf16.gmra.mrb[12].mxu0 %vm297_vm0, %v737_v63 }
 0x199   : > { %v2042_v25 = vpop.f32.mrb[0].mxu0 }
 0x19a   : > { %v844_v4 = vpop.f32.mrb[1].mxu0 }
 0x19b   : > { %v2043_v29 = vpop.f32.mrb[2].mxu0 }
 0x19c   : > { %v2791_v5 = vpack.c.bf16 %v2043_v29, %v2042_v25  ;;  %v847_v31 = vpop.f32.mrb[3].mxu0 }
 0x19d   : > { %v911_v35 = vpack.c.bf16 %v847_v31, %v844_v4 }
 0x19e   : > { %1259 = vrot.lane.b32.xlu1 %v2791_v5, %s2393_s8 }
 0x19f   : > { %1257 = vrot.lane.b32.xlu0 %v911_v35, %s2393_s8  ;;  %2072 = vmatprep.mubr.msk.bf16.mxu1 %vm943_vm6, %v911_v35 }
 0x1a1   : > { %v2046_v6 = vpop.f32.mrb[4].mxu0 }
 0x1a2   : > { %v860_v37 = vpop.f32.mrb[5].mxu0 }
 0x1a3   : > { %927 = vrot.lane.b32.xlu0 %v911_v35, %s2394_s9  ;;  %v2047_v60 = vpop.f32.mrb[6].mxu0 }
 0x1a4   : > { %v2798_v1 = vpack.c.bf16 %v2047_v60, %v2046_v6  ;;  %v863_v36 = vpop.f32.mrb[7].mxu0 }
 0x1a5   : > { %v2800_v43 = vpack.c.bf16 %v863_v36, %v860_v37 }
 0x1a7   : > { %929 = vrot.lane.b32.xlu0 %v2791_v5, %s2394_s9  ;;  %1261 = vrot.lane.b32.xlu1 %v2800_v43, %s2393_s8 }
 0x1a9   : > { %v2050_v50 = vpop.f32.mrb[8].mxu0 }
 0x1aa   : > { %v876_v19 = vpop.f32.mrb[9].mxu0 }
 0x1ab   : > { %931 = vrot.lane.b32.xlu0 %v2800_v43, %s2394_s9  ;;  %1263 = vrot.lane.b32.xlu1 %v2798_v1, %s2393_s8  ;;  %v2051_v30 = vpop.f32.mrb[10].mxu0 }
 0x1ac   : > { %v2810_v27 = vpack.c.bf16 %v2051_v30, %v2050_v50  ;;  %v879_v0 = vpop.f32.mrb[11].mxu0  ;;  %v2396_v30 = vmov -1e+30  }
 0x1ad   : > { %v2812_v44 = vpack.c.bf16 %v879_v0, %v876_v19  ;;  %v908_v19 = vand.u32 127, %v405_v33 }
 0x1af   : > { %933 = vrot.lane.b32.xlu0 %v2798_v1, %s2394_s9  ;;  %1265 = vrot.lane.b32.xlu1 %v2812_v44, %s2393_s8  ;;  %vm909_vm7 = vcmp.lt.s32.totalorder %v908_v19, 65 }
 0x1b0   : > { %v2937_v0 = vsel %vm909_vm7, 0.0, %v2396_v30 }
 0x1b1   : > { %v2054_v52 = vpop.f32.mrb[12].mxu0 }
 0x1b2   : > { %v892_v46 = vpop.f32.mrb[13].mxu0 }
 0x1b3   : > { %935 = vrot.lane.b32.xlu0 %v2812_v44, %s2394_s9  ;;  %1267 = vrot.lane.b32.xlu1 %v2810_v27, %s2393_s8  ;;  %v2055_v48 = vpop.f32.mrb[14].mxu0 }
 0x1b4   : > { %v2822_v54 = vpack.c.bf16 %v2055_v48, %v2054_v52  ;;  %v895_v23 = vpop.f32.mrb[15].mxu0 }
 0x1b5   : > { %v2824_v39 = vpack.c.bf16 %v895_v23, %v892_v46 }
 0x1b7   : > { %937 = vrot.lane.b32.xlu0 %v2810_v27, %s2394_s9  ;;  %1269 = vrot.lane.b32.xlu1 %v2824_v39, %s2393_s8 }
 0x1bb   : > { %939 = vrot.lane.b32.xlu0 %v2824_v39, %s2394_s9  ;;  %1271 = vrot.lane.b32.xlu1 %v2822_v54, %s2393_s8 }
 0x1bf   : > { %1243 = vrot.lane.b32.xlu0 %v2791_v5, %s2395_s10  ;;  %1241 = vrot.lane.b32.xlu1 %v911_v35, %s2395_s10 }
 0x1c3   : > { %1245 = vrot.lane.b32.xlu0 %v2800_v43, %s2395_s10  ;;  %941 = vrot.lane.b32.xlu1 %v2822_v54, %s2394_s9 }
 0x1c7   : > { %1249 = vrot.lane.b32.xlu0 %v2812_v44, %s2395_s10  ;;  %1247 = vrot.lane.b32.xlu1 %v2798_v1, %s2395_s10 }
 0x1cb   : > { %1253 = vrot.lane.b32.xlu0 %v2824_v39, %s2395_s10  ;;  %1251 = vrot.lane.b32.xlu1 %v2810_v27, %s2395_s10 }
 0x1cf   : > { %1574 = vrot.lane.b32.xlu0 %v2800_v43, %s2391_s28  ;;  %1255 = vrot.lane.b32.xlu1 %v2822_v54, %s2395_s10 }
 0x1d3   : > { %1578 = vrot.lane.b32.xlu0 %v2812_v44, %s2391_s28  ;;  %1570 = vrot.lane.b32.xlu1 %v911_v35, %s2391_s28 }
 0x1d7   : > { %1580 = vrot.lane.b32.xlu0 %v2810_v27, %s2391_s28  ;;  %1572 = vrot.lane.b32.xlu1 %v2791_v5, %s2391_s28 }
 0x1db   : > { %1584 = vrot.lane.b32.xlu0 %v2822_v54, %s2391_s28  ;;  %1576 = vrot.lane.b32.xlu1 %v2798_v1, %s2391_s28 }
 0x1df   : > { %1582 = vrot.lane.b32.xlu0 %v2824_v39, %s2391_s28  ;;  %1691 = vrot.lane.b32.xlu1 %v911_v35, %s2392_s29  ;;  %s1949_s28 = sshll.u32 %s3343_s22, 7 }
 0x1e0   : > { %s3297_s14 = scalar_lea.vmem %s3340_s6, %s1949_s28 }
 0x1e3   : > { %1693 = vrot.lane.b32.xlu1 %v2791_v5, %s2392_s29 }
 0x1e7   : > { %1695 = vrot.lane.b32.xlu1 %v2800_v43, %s2392_s29 }
 0x1eb   : > { %1697 = vrot.lane.b32.xlu1 %v2798_v1, %s2392_s29 }
 0x210   : > { %v1260_v51 = vpop.permute.xlu1 %1259 }
 0x211   : > { %v1258_v56 = vpop.permute.xlu0 %1257  ;;  %v1301_v17 = vsel %vm943_vm6, %v1260_v51, 0 }
 0x212   : > { %2224 = vmatprep.subr.msk.bf16.mxu0 %vm943_vm6, %v1258_v56  ;;  %v1298_v57 = vsel %vm943_vm6, %v1258_v56, 0 }
 0x213   : > { %2089 = vmatpush3.bf16.xpose.msra.mxu0 %v1298_v57 }
 0x214   : > { %2225 = vmatprep.subr.msk.bf16.mxu0 %vm943_vm6, %v1260_v51 }
 0x215   : > { %v928_v15 = vpop.permute.xlu0 %927 }
 0x216   : > { %2216 = vmatprep.subr.msk.bf16.mxu1 %vm943_vm6, %v928_v15  ;;  %v969_v47 = vsel %vm943_vm6, %v928_v15, 0 }
 0x217   : > { %2057 = vmatpush3.bf16.xpose.msra.mxu1 %v969_v47 }
 0x219   : > { %v930_v3 = vpop.permute.xlu0 %929  ;;  %v1262_v58 = vpop.permute.xlu1 %1261 }
 0x21a   : > { %2217 = vmatprep.subr.msk.bf16.mxu1 %vm943_vm6, %v930_v3  ;;  %v972_v61 = vsel %vm943_vm6, %v930_v3, 0  ;;  %v1304_v62 = vsel %vm943_vm6, %v1262_v58, 0 }
 0x21b   : > { %2091 = vmatpush3.bf16.xpose.msra.mxu0 %v1301_v17 }
 0x21c   : > { %2226 = vmatprep.subr.msk.bf16.mxu0 %vm943_vm6, %v1262_v58 }
 0x21d   : > { %v932_v26 = vpop.permute.xlu0 %931  ;;  %v1264_v53 = vpop.permute.xlu1 %1263 }
 0x21e   : > { %v975_v55 = vsel %vm943_vm6, %v932_v26, 0  ;;  %v1307_v9 = vsel %vm943_vm6, %v1264_v53, 0 }
 0x21f   : > { %2059 = vmatpush3.bf16.xpose.msra.mxu1 %v972_v61 }
 0x220   : > { %2218 = vmatprep.subr.msk.bf16.mxu1 %vm943_vm6, %v932_v26 }
 0x221   : > { %v1266_v32 = vpop.permute.xlu1 %1265  ;;  %v934_v38 = vpop.permute.xlu0 %933 }
 0x222   : > { %v978_v10 = vsel %vm943_vm6, %v934_v38, 0  ;;  %v1310_v7 = vsel %vm943_vm6, %v1266_v32, 0 }
 0x223   : > { %2093 = vmatpush3.bf16.xpose.msra.mxu0 %v1304_v62 }
 0x224   : > { %2227 = vmatprep.subr.msk.bf16.mxu0 %vm943_vm6, %v1264_v53 }
 0x225   : > { %v1268_v28 = vpop.permute.xlu1 %1267  ;;  %v936_v42 = vpop.permute.xlu0 %935 }
 0x226   : > { %v981_v49 = vsel %vm943_vm6, %v936_v42, 0  ;;  %v1313_v22 = vsel %vm943_vm6, %v1268_v28, 0 }
 0x227   : > { %2061 = vmatpush3.bf16.xpose.msra.mxu1 %v975_v55 }
 0x228   : > { %2219 = vmatprep.subr.msk.bf16.mxu1 %vm943_vm6, %v934_v38 }
 0x229   : > { %v1270_v20 = vpop.permute.xlu1 %1269  ;;  %v938_v34 = vpop.permute.xlu0 %937 }
 0x22a   : > { %v984_v16 = vsel %vm943_vm6, %v938_v34, 0  ;;  %v1316_v45 = vsel %vm943_vm6, %v1270_v20, 0 }
 0x22b   : > { %2095 = vmatpush3.bf16.xpose.msra.mxu0 %v1307_v9 }
 0x22c   : > { %2228 = vmatprep.subr.msk.bf16.mxu0 %vm943_vm6, %v1266_v32 }
 0x22d   : > { %v1272_v40 = vpop.permute.xlu1 %1271  ;;  %v940_v41 = vpop.permute.xlu0 %939 }
 0x22e   : > { %v987_v8 = vsel %vm943_vm6, %v940_v41, 0  ;;  %v1319_v25 = vsel %vm943_vm6, %v1272_v40, 0 }
 0x22f   : > { %2063 = vmatpush3.bf16.xpose.msra.mxu1 %v978_v10 }
 0x230   : > { %2220 = vmatprep.subr.msk.bf16.mxu1 %vm943_vm6, %v936_v42 }
 0x231   : > { %v1242_v2 = vpop.permute.xlu1 %1241  ;;  %v1244_v13 = vpop.permute.xlu0 %1243 }
 0x232   : > { %2104 = vmatprep.mubr.msk.bf16.mxu0 %vm943_vm6, %v1242_v2 }
 0x233   : > { %2097 = vmatpush3.bf16.xpose.msra.mxu0 %v1310_v7 }
 0x234   : > { %2229 = vmatprep.subr.msk.bf16.mxu0 %vm943_vm6, %v1268_v28 }
 0x235   : > { %v942_v11 = vpop.permute.xlu1 %941  ;;  %v1246_v18 = vpop.permute.xlu0 %1245 }
 0x236   : > { %v990_v31 = vsel %vm943_vm6, %v942_v11, 0 }
 0x237   : > { %2065 = vmatpush3.bf16.xpose.msra.mxu1 %v981_v49 }
 0x238   : > { %2221 = vmatprep.subr.msk.bf16.mxu1 %vm943_vm6, %v938_v34 }
 0x239   : > { %v1248_v12 = vpop.permute.xlu1 %1247  ;;  %v1250_v24 = vpop.permute.xlu0 %1249 }
 0x23b   : > { %2099 = vmatpush3.bf16.xpose.msra.mxu0 %v1313_v22 }
 0x23c   : > { %2230 = vmatprep.subr.msk.bf16.mxu0 %vm943_vm6, %v1270_v20 }
 0x23d   : > { %v1252_v14 = vpop.permute.xlu1 %1251  ;;  %v1254_v4 = vpop.permute.xlu0 %1253 }
 0x23f   : > { %2067 = vmatpush3.bf16.xpose.msra.mxu1 %v984_v16 }
 0x240   : > { %2222 = vmatprep.subr.msk.bf16.mxu1 %vm943_vm6, %v940_v41 }
 0x241   : > { %v1256_v21 = vpop.permute.xlu1 %1255  ;;  %v1575_v6 = vpop.permute.xlu0 %1574 }
 0x243   : > { %2101 = vmatpush3.bf16.xpose.msra.mxu0 %v1316_v45 }
 0x244   : > { %2231 = vmatprep.subr.msk.bf16.mxu0 %vm943_vm6, %v1272_v40 }
 0x245   : > { %v1571_v59 = vpop.permute.xlu1 %1570  ;;  %v1579_v60 = vpop.permute.xlu0 %1578 }
 0x247   : > { %2069 = vmatpush3.bf16.xpose.msra.mxu1 %v987_v8 }
 0x248   : > { %2223 = vmatprep.subr.msk.bf16.mxu1 %vm943_vm6, %v942_v11 }
 0x249   : > { %v1573_v63 = vpop.permute.xlu1 %1572 }
 0x24b   : > { %2103 = vmatpush3.bf16.xpose.msra.mxu0 %v1319_v25 }
 0x24d   : > { %v1577_v29 = vpop.permute.xlu1 %1576 }
 0x24f   : > { %2071 = vmatpush3.bf16.xpose.msra.mxu1 %v990_v31 }
 0x250   : > { %2120 = vmatprep.subr.bf16.mxu1 %v1571_v59 }
 0x251   : > { %v2898_v35 = vpop.permute.xlu1 %1691 }
 0x252   : > { %2105 = vmatmul.mubr.msk.bf16.vlgmr.msra.gmra.mrb[16].mxu0 %vm943_vm6, %v1244_v13  ;;  %2152 = vmatprep.subr.bf16.mxu0 %v2898_v35 }
 0x253   : > { %2108 = vmatprep.mubr.msk.bf16.mxu0 %vm943_vm6, %v1246_v18  ;;  %2153 = vmatpush3.bf16.msra.mxu0 %v2898_v35 }
 0x255   : > { %v2904_v37 = vpop.permute.xlu1 %1693 }
 0x256   : > { %2073 = vmatmul.mubr.msk.bf16.vlgmr.msra.gmra.mrb[0].mxu1 %vm943_vm6, %v2791_v5  ;;  %2154 = vmatprep.subr.bf16.mxu0 %v2904_v37 }
 0x257   : > { %2076 = vmatprep.mubr.msk.bf16.mxu1 %vm943_vm6, %v2800_v43  ;;  %2121 = vmatpush3.bf16.msra.mxu1 %v1571_v59  ;;  %v1581_v43 = vpop.permute.xlu0 %1580 }
 0x258   : > { %2122 = vmatprep.subr.bf16.mxu1 %v1573_v63  ;;  %2155 = vmatpush3.bf16.msra.mxu0 %v2904_v37 }
 0x259   : > { %v2912_v36 = vpop.permute.xlu1 %1695 }
 0x25a   : > { %2109 = vmatmul.mubr.msk.bf16.gmra.mrb[20].mxu0 %vm943_vm6, %v1248_v12  ;;  %2156 = vmatprep.subr.bf16.mxu0 %v2912_v36 }
 0x25b   : > { %2112 = vmatprep.mubr.msk.bf16.mxu0 %vm943_vm6, %v1250_v24  ;;  %2123 = vmatpush3.bf16.msra.mxu1 %v1573_v63  ;;  %v1585_v50 = vpop.permute.xlu0 %1584 }
 0x25c   : > { %2124 = vmatprep.subr.bf16.mxu1 %v1575_v6  ;;  %2157 = vmatpush3.bf16.msra.mxu0 %v2912_v36 }
 0x25d   : > { %v2918_v5 = vpop.permute.xlu1 %1697 }
 0x25e   : > { %2077 = vmatmul.mubr.msk.bf16.gmra.mrb[4].mxu1 %vm943_vm6, %v2798_v1  ;;  %2158 = vmatprep.subr.bf16.mxu0 %v2918_v5 }
 0x25f   : > { %2080 = vmatprep.mubr.msk.bf16.mxu1 %vm943_vm6, %v2812_v44  ;;  %2125 = vmatpush3.bf16.msra.mxu1 %v1575_v6  ;;  %v1583_v1 = vpop.permute.xlu0 %1582 }
 0x260   : > { %2126 = vmatprep.subr.bf16.mxu1 %v1577_v29  ;;  %2159 = vmatpush3.bf16.msra.mxu0 %v2918_v5 }
 0x262   : > { %2113 = vmatmul.mubr.msk.bf16.gmra.mrb[24].mxu0 %vm943_vm6, %v1252_v14 }
 0x263   : > { %2116 = vmatprep.mubr.msk.bf16.mxu0 %vm943_vm6, %v1254_v4  ;;  %2127 = vmatpush3.bf16.msra.mxu1 %v1577_v29 }
 0x264   : > { %2128 = vmatprep.subr.bf16.mxu1 %v1579_v60 }
 0x266   : > { %2081 = vmatmul.mubr.msk.bf16.gmra.mrb[8].mxu1 %vm943_vm6, %v2810_v27 }
 0x267   : > { %2084 = vmatprep.mubr.msk.bf16.mxu1 %vm943_vm6, %v2824_v39  ;;  %2129 = vmatpush3.bf16.msra.mxu1 %v1579_v60 }
 0x268   : > { %2130 = vmatprep.subr.bf16.mxu1 %v1581_v43 }
 0x26a   : > { %2117 = vmatmul.mubr.msk.bf16.gmra.mrb[28].mxu0 %vm943_vm6, %v1256_v21 }
 0x26b   : > { %2131 = vmatpush3.bf16.msra.mxu1 %v1581_v43 }
 0x26c   : > { %2132 = vmatprep.subr.bf16.mxu1 %v1583_v1 }
 0x26e   : > { %2085 = vmatmul.mubr.msk.bf16.gmra.mrb[12].mxu1 %vm943_vm6, %v2822_v54 }
 0x26f   : > { %2133 = vmatpush3.bf16.msra.mxu1 %v1583_v1 }
 0x270   : > { %2134 = vmatprep.subr.bf16.mxu1 %v1585_v50 }
 0x273   : > { %2135 = vmatpush3.bf16.msra.mxu1 %v1585_v50 }
 0x274   : > { %2184 = vmatprep.subr.bf16.mxu1 %v2898_v35 }
 0x325   : > { %v2106_v52 = vpop.f32.mrb[16].mxu0 }
 0x326   : > { %v2940_v46 = vadd.f32 %v2106_v52, %v2937_v0  ;;  %v1355_v48 = vpop.f32.mrb[17].mxu0 }
 0x327   : > { %v2943_v23 = vadd.f32 %v1355_v48, %v2937_v0  ;;  %v2107_v56 = vpop.f32.mrb[18].mxu0 }
 0x328   : > { %v2946_v57 = vadd.f32 %v2107_v56, %v2937_v0  ;;  %1422 = vmax.xlane.f32.xlu0 %v2940_v46  ;;  %v1358_v51 = vpop.f32.mrb[19].mxu0 }
 0x329   : > { %v2950_v33 = vadd.f32 %v1358_v51, %v2937_v0  ;;  %v2074_v15 = vpop.f32.mrb[0].mxu1 }
 0x32a   : > { %v2953_v47 = vadd.f32 %v2074_v15, %v2937_v0  ;;  %v1026_v3 = vpop.f32.mrb[1].mxu1 }
 0x32b   : > { %v2956_v58 = vadd.f32 %v1026_v3, %v2937_v0  ;;  %v2075_v17 = vpop.f32.mrb[2].mxu1 }
 0x32c   : > { %v2959_v26 = vadd.f32 %v2075_v17, %v2937_v0  ;;  %1418 = vmax.xlane.f32.xlu0 %v2943_v23  ;;  %1093 = vmax.xlane.f32.xlu1 %v2953_v47  ;;  %v1029_v53 = vpop.f32.mrb[3].mxu1 }
 0x32d   : > { %v2964_v61 = vadd.f32 %v1029_v53, %v2937_v0  ;;  %v2110_v62 = vpop.f32.mrb[20].mxu0 }
 0x32e   : > { %v2967_v32 = vadd.f32 %v2110_v62, %v2937_v0  ;;  %v1371_v38 = vpop.f32.mrb[21].mxu0 }
 0x32f   : > { %v2970_v28 = vadd.f32 %v1371_v38, %v2937_v0  ;;  %v2111_v55 = vpop.f32.mrb[22].mxu0 }
 0x330   : > { %v2973_v42 = vadd.f32 %v2111_v55, %v2937_v0  ;;  %1424 = vmax.xlane.f32.xlu0 %v2946_v57  ;;  %1089 = vmax.xlane.f32.xlu1 %v2956_v58  ;;  %v1374_v20 = vpop.f32.mrb[23].mxu0 }
 0x331   : > { %v2978_v9 = vadd.f32 %v1374_v20, %v2937_v0  ;;  %v2078_v40 = vpop.f32.mrb[4].mxu1 }
 0x332   : > { %v2981_v10 = vadd.f32 %v2078_v40, %v2937_v0  ;;  %v1042_v34 = vpop.f32.mrb[5].mxu1 }
 0x333   : > { %v2984_v2 = vadd.f32 %v1042_v34, %v2937_v0  ;;  %v2079_v7 = vpop.f32.mrb[6].mxu1 }
 0x334   : > { %v2987_v41 = vadd.f32 %v2079_v7, %v2937_v0  ;;  %1095 = vmax.xlane.f32.xlu0 %v2959_v26  ;;  %v1045_v11 = vpop.f32.mrb[7].mxu1  ;;  %1420 = vmax.xlane.f32.xlu1 %v2950_v33 }
 0x335   : > { %v2992_v49 = vadd.f32 %v1045_v11, %v2937_v0  ;;  %v2114_v12 = vpop.f32.mrb[24].mxu0 }
 0x336   : > { %v2995_v22 = vadd.f32 %v2114_v12, %v2937_v0  ;;  %v1387_v13 = vpop.f32.mrb[25].mxu0 }
 0x337   : > { %v2998_v14 = vadd.f32 %v1387_v13, %v2937_v0  ;;  %v2115_v16 = vpop.f32.mrb[26].mxu0 }
 0x338   : > { %v3001_v18 = vadd.f32 %v2115_v16, %v2937_v0  ;;  %1091 = vmax.xlane.f32.xlu0 %v2964_v61  ;;  %1430 = vmax.xlane.f32.xlu1 %v2967_v32  ;;  %v1390_v21 = vpop.f32.mrb[27].mxu0 }
 0x339   : > { %v3006_v45 = vadd.f32 %v1390_v21, %v2937_v0  ;;  %v2082_v59 = vpop.f32.mrb[8].mxu1 }
 0x33a   : > { %v3009_v8 = vadd.f32 %v2082_v59, %v2937_v0  ;;  %v1058_v24 = vpop.f32.mrb[9].mxu1 }
 0x33b   : > { %v3012_v63 = vadd.f32 %v1058_v24, %v2937_v0  ;;  %v2083_v25 = vpop.f32.mrb[10].mxu1 }
 0x33c   : > { %v3015_v4 = vadd.f32 %v2083_v25, %v2937_v0  ;;  %v1061_v29 = vpop.f32.mrb[11].mxu1  ;;  %1101 = vmax.xlane.f32.xlu1 %v2981_v10  ;;  %1432 = vmax.xlane.f32.xlu0 %v2973_v42 }
 0x33d   : > { %v3020_v31 = vadd.f32 %v1061_v29, %v2937_v0  ;;  %v2118_v6 = vpop.f32.mrb[28].mxu0 }
 0x33e   : > { %v3023_v60 = vadd.f32 %v2118_v6, %v2937_v0  ;;  %v1403_v43 = vpop.f32.mrb[29].mxu0 }
 0x33f   : > { %v3026_v50 = vadd.f32 %v1403_v43, %v2937_v0  ;;  %v2119_v1 = vpop.f32.mrb[30].mxu0 }
 0x340   : > { %v3029_v19 = vadd.f32 %v2119_v1, %v2937_v0  ;;  %1103 = vmax.xlane.f32.xlu0 %v2987_v41  ;;  %1426 = vmax.xlane.f32.xlu1 %v2970_v28  ;;  %v1406_v30 = vpop.f32.mrb[31].mxu0 }
 0x341   : > { %v3034_v52 = vadd.f32 %v1406_v30, %v2937_v0  ;;  %v2086_v48 = vpop.f32.mrb[12].mxu1 }
 0x342   : > { %v3037_v56 = vadd.f32 %v2086_v48, %v2937_v0  ;;  %v1074_v51 = vpop.f32.mrb[13].mxu1 }
 0x343   : > { %v3040_v15 = vadd.f32 %v1074_v51, %v2937_v0  ;;  %v2087_v3 = vpop.f32.mrb[14].mxu1 }
 0x344   : > { %v3043_v17 = vadd.f32 %v2087_v3, %v2937_v0  ;;  %v1077_v53 = vpop.f32.mrb[15].mxu1  ;;  %1428 = vmax.xlane.f32.xlu0 %v2978_v9  ;;  %1097 = vmax.xlane.f32.xlu1 %v2984_v2 }
 0x345   : > { %v3048_v62 = vadd.f32 %v1077_v53, %v2937_v0 }
 0x348   : > { %1099 = vmax.xlane.f32.xlu0 %v2992_v49  ;;  %1438 = vmax.xlane.f32.xlu1 %v2995_v22 }
 0x34c   : > { %1109 = vmax.xlane.f32.xlu1 %v3009_v8  ;;  %1440 = vmax.xlane.f32.xlu0 %v3001_v18 }
 0x350   : > { %1111 = vmax.xlane.f32.xlu0 %v3015_v4  ;;  %1434 = vmax.xlane.f32.xlu1 %v2998_v14 }
 0x354   : > { %1436 = vmax.xlane.f32.xlu0 %v3006_v45  ;;  %1105 = vmax.xlane.f32.xlu1 %v3012_v63 }
 0x358   : > { %1107 = vmax.xlane.f32.xlu0 %v3020_v31  ;;  %1446 = vmax.xlane.f32.xlu1 %v3023_v60 }
 0x35c   : > { %1117 = vmax.xlane.f32.xlu1 %v3037_v56 }
 0x360   : > { %1442 = vmax.xlane.f32.xlu1 %v3026_v50 }
 0x364   : > { %1113 = vmax.xlane.f32.xlu1 %v3040_v15 }
 0x36e   : > { %1701 = vrot.lane.b32.xlu0 %v2810_v27, %s2392_s29 }
 0x375   : > { %1699 = vrot.lane.b32.xlu1 %v2812_v44, %s2392_s29 }
 0x38d   : > { %1448 = vmax.xlane.f32.xlu0 %v3029_v19 }
 0x391   : > { %1119 = vmax.xlane.f32.xlu0 %v3043_v17 }
 0x395   : > { %1444 = vmax.xlane.f32.xlu0 %v3034_v52 }
 0x399   : > { %1115 = vmax.xlane.f32.xlu0 %v3048_v62 }
 0x3b5   : > { %v1423_v0 = vpop.xlane.xlu0 %1422 }
 0x3b6   : > { %v1452_v38 = vsub.f32 %v2940_v46, %v1423_v0 }
 0x3b8   : > { %v1470_v55 = vmul.f32 1.442695, %v1452_v38 }
 0x3b9   : > { %v1419_v20 = vpop.xlane.xlu0 %1418  ;;  %v1094_v40 = vpop.xlane.xlu1 %1093 }
 0x3ba   : > { %2254 = vpow2.f32 %v1470_v55  ;;  %v1123_v27 = vsub.f32 %v2953_v47, %v1094_v40  ;;  %v1450_v34 = vsub.f32 %v2943_v23, %v1419_v20 }
 0x3bc   : > { %v1141_v44 = vmul.f32 1.442695, %v1123_v27  ;;  %v1466_v12 = vmul.f32 1.442695, %v1450_v34 }
 0x3bd   : > { %v1425_v7 = vpop.xlane.xlu0 %1424  ;;  %v1090_v11 = vpop.xlane.xlu1 %1089 }
 0x3be   : > { %2256 = vpow2.f32 %v1141_v44  ;;  %v1121_v13 = vsub.f32 %v2956_v58, %v1090_v11  ;;  %v1453_v46 = vsub.f32 %v2946_v57, %v1425_v7 }
 0x3bf   : > { %2258 = vpow2.f32 %v1466_v12 }
 0x3c0   : > { %v1137_v24 = vmul.f32 1.442695, %v1121_v13  ;;  %v1472_v43 = vmul.f32 1.442695, %v1453_v46 }
 0x3c1   : > { %v1096_v16 = vpop.xlane.xlu0 %1095  ;;  %v1421_v21 = vpop.xlane.xlu1 %1420 }
 0x3c2   : > { %v1124_v59 = vsub.f32 %v2959_v26, %v1096_v16  ;;  %v1451_v26 = vsub.f32 %v2950_v33, %v1421_v21 }
 0x3c4   : > { %v3077_v25 = vpop.eup %2254  ;;  %v1143_v47 = vmul.f32 1.442695, %v1124_v59  ;;  %v1468_v53 = vmul.f32 1.442695, %v1451_v26 }
 0x3c5   : > { %v1092_v29 = vpop.xlane.xlu0 %1091  ;;  %1502 = vadd.xlane.f32.xlu0 %v3077_v25  ;;  %v1431_v23 = vpop.xlane.xlu1 %1430 }
 0x3c6   : > { %2260 = vpow2.f32 %v1143_v47  ;;  %v1122_v6 = vsub.f32 %v2964_v61, %v1092_v29  ;;  %v1456_v58 = vsub.f32 %v2967_v32, %v1431_v23 }
 0x3c7   : > { %2262 = vpow2.f32 %v1137_v24 }
 0x3c8   : > { %v1139_v1 = vmul.f32 1.442695, %v1122_v6  ;;  %v3083_v30 = vpop.eup %2256  ;;  %v1478_v51 = vmul.f32 1.442695, %v1456_v58 }
 0x3c9   : > { %v1433_v57 = vpop.xlane.xlu0 %1432  ;;  %v1102_v48 = vpop.xlane.xlu1 %1101  ;;  %1173 = vadd.xlane.f32.xlu0 %v3083_v30 }
 0x3ca   : > { %2264 = vpow2.f32 %v1139_v1  ;;  %v1127_v3 = vsub.f32 %v2981_v10, %v1102_v48  ;;  %v3087_v61 = vpop.eup %2258  ;;  %v1457_v33 = vsub.f32 %v2973_v42, %v1433_v57 }
 0x3cb   : > { %2266 = vpow2.f32 %v1472_v43 }
 0x3cc   : > { %2268 = vpow2.f32 %v1478_v51  ;;  %v1149_v38 = vmul.f32 1.442695, %v1127_v3  ;;  %v1480_v44 = vmul.f32 1.442695, %v1457_v33 }
 0x3cd   : > { %v1104_v32 = vpop.xlane.xlu0 %1103  ;;  %v1427_v0 = vpop.xlane.xlu1 %1426  ;;  %1498 = vadd.xlane.f32.xlu0 %v3087_v61  ;;  %2270 = vpow2.f32 %v1468_v53 }
 0x3ce   : > { %v1454_v55 = vsub.f32 %v2970_v28, %v1427_v0  ;;  %2272 = vpow2.f32 %v1149_v38  ;;  %v1128_v7 = vsub.f32 %v2987_v41, %v1104_v32 }
 0x3d0   : > { %v3092_v20 = vpop.eup %2260  ;;  %v1474_v40 = vmul.f32 1.442695, %v1454_v55  ;;  %v1151_v59 = vmul.f32 1.442695, %v1128_v7 }
 0x3d1   : > { %v3094_v27 = vpop.eup %2262  ;;  %v1429_v10 = vpop.xlane.xlu0 %1428  ;;  %1175 = vadd.xlane.f32.xlu1 %v3092_v20 }
 0x3d2   : > { %v1098_v34 = vpop.xlane.xlu1 %1097  ;;  %1169 = vadd.xlane.f32.xlu0 %v3094_v27  ;;  %2274 = vpow2.f32 %v1474_v40  ;;  %v1455_v28 = vsub.f32 %v2978_v9, %v1429_v10 }
 0x3d3   : > { %v1125_v42 = vsub.f32 %v2984_v2, %v1098_v34  ;;  %2276 = vpow2.f32 %v1480_v44 }
 0x3d4   : > { %v3101_v11 = vpop.eup %2264  ;;  %v1476_v41 = vmul.f32 1.442695, %v1455_v28 }
 0x3d5   : > { %v1145_v12 = vmul.f32 1.442695, %v1125_v42  ;;  %v3103_v13 = vpop.eup %2266  ;;  %v1100_v16 = vpop.xlane.xlu0 %1099  ;;  %1171 = vadd.xlane.f32.xlu1 %v3101_v11 }
 0x3d6   : > { %v1439_v21 = vpop.xlane.xlu1 %1438  ;;  %1504 = vadd.xlane.f32.xlu0 %v3103_v13  ;;  %v1126_v2 = vsub.f32 %v2992_v49, %v1100_v16  ;;  %v3108_v46 = vpop.eup %2268 }
 0x3d7   : > { %2278 = vpow2.f32 %v1145_v12  ;;  %v3110_v9 = vpop.eup %2270  ;;  %v1460_v47 = vsub.f32 %v2995_v22, %v1439_v21 }
 0x3d8   : > { %2280 = vpow2.f32 %v1151_v59  ;;  %v1147_v23 = vmul.f32 1.442695, %v1126_v2  ;;  %v3115_v6 = vpop.eup %2272 }
 0x3d9   : > { %1510 = vadd.xlane.f32.xlu1 %v3108_v46  ;;  %v1441_v29 = vpop.xlane.xlu0 %1440  ;;  %2282 = vpow2.f32 %v1476_v41  ;;  %v1486_v43 = vmul.f32 1.442695, %v1460_v47 }
 0x3da   : > { %v1110_v24 = vpop.xlane.xlu1 %1109  ;;  %1500 = vadd.xlane.f32.xlu0 %v3110_v9  ;;  %2284 = vpow2.f32 %v1147_v23  ;;  %v1461_v32 = vsub.f32 %v3001_v18, %v1441_v29 }
 0x3db   : > { %v1131_v26 = vsub.f32 %v3009_v8, %v1110_v24  ;;  %2286 = vpow2.f32 %v1486_v43 }
 0x3dc   : > { %v3117_v58 = vpop.eup %2274  ;;  %v1488_v40 = vmul.f32 1.442695, %v1461_v32 }
 0x3dd   : > { %1506 = vadd.xlane.f32.xlu1 %v3117_v58  ;;  %v3123_v22 = vpop.eup %2276  ;;  %v1112_v57 = vpop.xlane.xlu0 %1111  ;;  %v1157_v53 = vmul.f32 1.442695, %v1131_v26 }
 0x3de   : > { %v1435_v49 = vpop.xlane.xlu1 %1434  ;;  %1181 = vadd.xlane.f32.xlu0 %v3115_v6  ;;  %v1132_v10 = vsub.f32 %v3015_v4, %v1112_v57 }
 0x3df   : > { %v1458_v1 = vsub.f32 %v2998_v14, %v1435_v49 }
 0x3e0   : > { %v1159_v44 = vmul.f32 1.442695, %v1132_v10 }
 0x3e1   : > { %v1482_v48 = vmul.f32 1.442695, %v1458_v1  ;;  %v3125_v51 = vpop.eup %2278  ;;  %1512 = vadd.xlane.f32.xlu1 %v3123_v22  ;;  %v1437_v55 = vpop.xlane.xlu0 %1436 }
 0x3e2   : > { %v1106_v3 = vpop.xlane.xlu1 %1105  ;;  %1177 = vadd.xlane.f32.xlu0 %v3125_v51  ;;  %v3131_v14 = vpop.eup %2280  ;;  %v1459_v7 = vsub.f32 %v3006_v45, %v1437_v55 }
 0x3e3   : > { %v1129_v8 = vsub.f32 %v3012_v63, %v1106_v3  ;;  %2288 = vpow2.f32 %v1482_v48  ;;  %v3133_v33 = vpop.eup %2282 }
 0x3e4   : > { %2290 = vpow2.f32 %v1157_v53  ;;  %v3138_v63 = vpop.eup %2284 }
 0x3e5   : > { %v1153_v0 = vmul.f32 1.442695, %v1129_v8  ;;  %1183 = vadd.xlane.f32.xlu1 %v3131_v14  ;;  %v3143_v42 = vpop.eup %2286  ;;  %v1108_v28 = vpop.xlane.xlu0 %1107 }
 0x3e6   : > { %v1447_v38 = vpop.xlane.xlu1 %1446  ;;  %1508 = vadd.xlane.f32.xlu0 %v3133_v33  ;;  %v1130_v59 = vsub.f32 %v3020_v31, %v1108_v28 }
 0x3e7   : > { %2292 = vpow2.f32 %v1153_v0  ;;  %v1464_v29 = vsub.f32 %v3023_v60, %v1447_v38 }
 0x3e8   : > { %2294 = vpow2.f32 %v1488_v40  ;;  %v1155_v47 = vmul.f32 1.442695, %v1130_v59 }
 0x3e9   : > { %v1494_v31 = vmul.f32 1.442695, %v1464_v29  ;;  %v3164_v49 = vpop.permute.xlu0 %1701 }
 0x3ea   : > { %v1118_v18 = vpop.xlane.xlu1 %1117  ;;  %1179 = vadd.xlane.f32.xlu0 %v3138_v63 }
 0x3eb   : > { %v1135_v34 = vsub.f32 %v3037_v56, %v1118_v18  ;;  %v1484_v56 = vmul.f32 1.442695, %v1459_v7 }
 0x3ed   : > { %v1165_v12 = vmul.f32 1.442695, %v1135_v34  ;;  %v3145_v16 = vpop.eup %2288 }
 0x3ee   : > { %v1443_v21 = vpop.xlane.xlu1 %1442  ;;  %1518 = vadd.xlane.f32.xlu0 %v3143_v42  ;;  %1514 = vadd.xlane.f32.xlu1 %v3145_v16  ;;  %v3151_v41 = vpop.eup %2290 }
 0x3ef   : > { %2296 = vpow2.f32 %v1165_v12  ;;  %v1462_v4 = vsub.f32 %v3026_v50, %v1443_v21 }
 0x3f0   : > { %2298 = vpow2.f32 %v1159_v44 }
 0x3f1   : > { %v1490_v45 = vmul.f32 1.442695, %v1462_v4  ;;  %v3153_v2 = vpop.eup %2292 }
 0x3f2   : > { %v1114_v24 = vpop.xlane.xlu1 %1113  ;;  %1189 = vadd.xlane.f32.xlu0 %v3151_v41  ;;  %1185 = vadd.xlane.f32.xlu1 %v3153_v2  ;;  %v3158_v50 = vpop.eup %2294 }
 0x3f3   : > { %2300 = vpow2.f32 %v1490_v45  ;;  %v1133_v43 = vsub.f32 %v3040_v15, %v1114_v24 }
 0x3f4   : > { %2302 = vpow2.f32 %v1484_v56 }
 0x3f5   : > { %2304 = vpow2.f32 %v1155_v47  ;;  %v1161_v1 = vmul.f32 1.442695, %v1133_v43 }
 0x3f6   : > { %v3160_v23 = vpop.permute.xlu1 %1699  ;;  %1520 = vadd.xlane.f32.xlu0 %v3158_v50  ;;  %2306 = vpow2.f32 %v1494_v31 }
 0x3f7   : > { %2160 = vmatprep.subr.bf16.mxu0 %v3160_v23  ;;  %2308 = vpow2.f32 %v1161_v1 }
 0x3f8   : > { %2161 = vmatpush3.bf16.msra.mxu0 %v3160_v23 }
 0x3f9   : > { %v3168_v26 = vpop.eup %2296  ;;  %2162 = vmatprep.subr.bf16.mxu0 %v3164_v49 }
 0x3fa   : > { %v3171_v60 = vpop.eup %2298  ;;  %1197 = vadd.xlane.f32.xlu1 %v3168_v26 }
 0x3fb   : > { %1191 = vadd.xlane.f32.xlu0 %v3171_v60 }
 0x3fc   : > { %2163 = vmatpush3.bf16.msra.mxu0 %v3164_v49 }
 0x3fd   : > { %v3176_v57 = vpop.eup %2300 }
 0x3fe   : > { %v3178_v48 = vpop.eup %2302  ;;  %1522 = vadd.xlane.f32.xlu1 %v3176_v57 }
 0x3ff   : > { %1516 = vadd.xlane.f32.xlu0 %v3178_v48  ;;  %v3182_v15 = vpop.eup %2304 }
 0x400   : > { %v3185_v3 = vpop.eup %2306 }
 0x401   : > { %v3188_v53 = vpop.eup %2308 }
 0x403   : > { %1187 = vadd.xlane.f32.xlu0 %v3182_v15 }
 0x407   : > { %1526 = vadd.xlane.f32.xlu0 %v3185_v3 }
 0x40b   : > { %1193 = vadd.xlane.f32.xlu0 %v3188_v53 }
 0x41a   : > { %v1449_v8 = vpop.xlane.xlu0 %1448 }
 0x41b   : > { %v1465_v32 = vsub.f32 %v3029_v19, %v1449_v8 }
 0x41d   : > { %v1496_v0 = vmul.f32 1.442695, %v1465_v32 }
 0x41e   : > { %v1120_v38 = vpop.xlane.xlu0 %1119 }
 0x41f   : > { %2310 = vpow2.f32 %v1496_v0  ;;  %v1136_v55 = vsub.f32 %v3043_v17, %v1120_v38 }
 0x421   : > { %v1167_v40 = vmul.f32 1.442695, %v1136_v55 }
 0x422   : > { %v1445_v10 = vpop.xlane.xlu0 %1444 }
 0x423   : > { %2312 = vpow2.f32 %v1167_v40  ;;  %v1463_v18 = vsub.f32 %v3034_v52, %v1445_v10 }
 0x425   : > { %v1492_v34 = vmul.f32 1.442695, %v1463_v18 }
 0x426   : > { %v1116_v44 = vpop.xlane.xlu0 %1115 }
 0x427   : > { %2314 = vpow2.f32 %v1492_v34  ;;  %v1134_v7 = vsub.f32 %v3048_v62, %v1116_v44 }
 0x429   : > { %v3195_v28 = vpop.eup %2310  ;;  %v1163_v12 = vmul.f32 1.442695, %v1134_v7 }
 0x42a   : > { %1528 = vadd.xlane.f32.xlu1 %v3195_v28 }
 0x42b   : > { %2316 = vpow2.f32 %v1163_v12 }
 0x42d   : > { %v3198_v19 = vpop.eup %2312 }
 0x42e   : > { %1199 = vadd.xlane.f32.xlu1 %v3198_v19 }
 0x431   : > { %v3201_v17 = vpop.eup %2314 }
 0x432   : > { %1524 = vadd.xlane.f32.xlu0 %v3201_v17 }
 0x435   : > { %v3204_v52 = vpop.eup %2316 }
 0x436   : > { %1195 = vadd.xlane.f32.xlu0 %v3204_v52 }
 0x43f   : > { %1705 = vrot.lane.b32.xlu1 %v2822_v54, %s2392_s29 }
 0x44c   : > { %1703 = vrot.lane.b32.xlu0 %v2824_v39, %s2392_s29 }
 0x452   : > { %v1503_v62 = vpop.xlane.xlu0 %1502 }
 0x456   : > { %v1174_v21 = vpop.xlane.xlu0 %1173 }
 0x457   : > { %2318 = vrcp.f32 %v1174_v21 }
 0x45a   : > { %v1499_v4 = vpop.xlane.xlu0 %1498 }
 0x45e   : > { %v1176_v56 = vpop.xlane.xlu1 %1175 }
 0x45f   : > { %v1170_v59 = vpop.xlane.xlu0 %1169  ;;  %2320 = vrcp.f32 %v1176_v56 }
 0x460   : > { %2322 = vrcp.f32 %v1170_v59 }
 0x461   : > { %v2319_v29 = vpop.eup %2318 }
 0x462   : > { %v1172_v45 = vpop.xlane.xlu1 %1171  ;;  %v3212_v39 = vmul.f32 %v2319_v29, %v3083_v30 }
 0x463   : > { %v1505_v24 = vpop.xlane.xlu0 %1504  ;;  %2324 = vrcp.f32 %v1172_v45 }
 0x464   : > { %2326 = vrcp.f32 %v1505_v24 }
 0x465   : > { %2328 = vrcp.f32 %v1499_v4 }
 0x466   : > { %v1511_v47 = vpop.xlane.xlu1 %1510  ;;  %2330 = vrcp.f32 %v1503_v62 }
 0x467   : > { %v1501_v54 = vpop.xlane.xlu0 %1500 }
 0x468   : > { %2332 = vrcp.f32 %v1501_v54 }
 0x469   : > { %v2321_v31 = vpop.eup %2320  ;;  %2334 = vrcp.f32 %v1511_v47 }
 0x46a   : > { %v3215_v43 = vmul.f32 %v2321_v31, %v3092_v20  ;;  %v2323_v1 = vpop.eup %2322  ;;  %v1507_v32 = vpop.xlane.xlu1 %1506 }
 0x46b   : > { %v1182_v8 = vpop.xlane.xlu0 %1181  ;;  %v1217_v55 = vmul.f32 %v2323_v1, %v3094_v27 }
 0x46c   : > { %v1234_v0 = vpack.c.bf16 %v3215_v43, %v3212_v39 }
 0x46d   : > { %v2325_v38 = vpop.eup %2324 }
 0x46e   : > { %v1218_v40 = vmul.f32 %v2325_v38, %v3101_v11  ;;  %v2327_v10 = vpop.eup %2326  ;;  %v1513_v34 = vpop.xlane.xlu1 %1512 }
 0x46f   : > { %v1178_v18 = vpop.xlane.xlu0 %1177  ;;  %v2329_v44 = vpop.eup %2328  ;;  %2336 = vrcp.f32 %v1513_v34  ;;  %v1549_v12 = vmul.f32 %v2327_v10, %v3103_v13 }
 0x470   : > { %v1233_v30 = vpack.c.bf16 %v1218_v40, %v1217_v55  ;;  %v2331_v7 = vpop.eup %2330  ;;  %2338 = vrcp.f32 %v1507_v32  ;;  %v1546_v27 = vmul.f32 %v2329_v44, %v3087_v61 }
 0x471   : > { %2340 = vrcp.f32 %v1182_v8  ;;  %v1548_v4 = vmul.f32 %v2331_v7, %v3077_v25 }
 0x472   : > { %v2333_v20 = vpop.eup %2332  ;;  %2168 = vmatprep.mubr.bf16.mxu0 %v1233_v30  ;;  %v1184_v21 = vpop.xlane.xlu1 %1183 }
 0x473   : > { %v1509_v62 = vpop.xlane.xlu0 %1508  ;;  %v1547_v11 = vmul.f32 %v2333_v20, %v3110_v9  ;;  %v1563_v59 = vpack.c.bf16 %v1549_v12, %v1548_v4  ;;  %v2335_v13 = vpop.eup %2334 }
 0x474   : > { %2342 = vrcp.f32 %v1509_v62  ;;  %v1552_v32 = vmul.f32 %v2335_v13, %v3108_v46 }
 0x475   : > { %2344 = vrcp.f32 %v1184_v21  ;;  %v1562_v56 = vpack.c.bf16 %v1547_v11, %v1546_v27 }
 0x476   : > { %2346 = vrcp.f32 %v1178_v18 }
 0x477   : > { %2136 = vmatprep.mubr.bf16.mxu1 %v1562_v56  ;;  %v1180_v45 = vpop.xlane.xlu0 %1179 }
 0x478   : > { %2348 = vrcp.f32 %v1180_v45  ;;  %2137 = vmatmul.mubr.bf16.vlgmr.msra.gmra.mrb[16].mxu1 %v1563_v59 }
 0x479   : > { %2192 = vmatpush3.bf16.msra.mxu1 %v2898_v35  ;;  %v2337_v24 = vpop.eup %2336 }
 0x47a   : > { %2185 = vmatprep.subr.bf16.mxu1 %v2904_v37  ;;  %v2339_v47 = vpop.eup %2338  ;;  %v1553_v29 = vmul.f32 %v2337_v24, %v3123_v22 }
 0x47b   : > { %v1519_v61 = vpop.xlane.xlu0 %1518  ;;  %v2341_v9 = vpop.eup %2340  ;;  %v1550_v1 = vmul.f32 %v2339_v47, %v3117_v58 }
 0x47c   : > { %v3234_v38 = vmul.f32 %v2341_v9, %v3115_v6  ;;  %v1565_v22 = vpack.c.bf16 %v1553_v29, %v1552_v32 }
 0x47d   : > { %2193 = vmatpush3.bf16.msra.mxu1 %v2904_v37 }
 0x47e   : > { %v2343_v25 = vpop.eup %2342  ;;  %2186 = vmatprep.subr.bf16.mxu1 %v2912_v36 }
 0x47f   : > { %v2345_v54 = vpop.eup %2344  ;;  %v1190_v31 = vpop.xlane.xlu0 %1189  ;;  %v1551_v35 = vmul.f32 %v2343_v25, %v3133_v33 }
 0x480   : > { %v2347_v8 = vpop.eup %2346  ;;  %v3237_v55 = vmul.f32 %v2345_v54, %v3131_v14  ;;  %2350 = vrcp.f32 %v1190_v31  ;;  %v1515_v14 = vpop.xlane.xlu1 %1514 }
 0x481   : > { %2194 = vmatpush3.bf16.msra.mxu1 %v2912_v36  ;;  %v1564_v37 = vpack.c.bf16 %v1551_v35, %v1550_v1  ;;  %v3244_v46 = vmul.f32 %v2347_v8, %v3125_v51 }
 0x482   : > { %v2349_v40 = vpop.eup %2348  ;;  %2187 = vmatprep.subr.bf16.mxu1 %v2918_v5  ;;  %v1236_v58 = vpack.c.bf16 %v3237_v55, %v3234_v38 }
 0x483   : > { %v1521_v33 = vpop.xlane.xlu0 %1520  ;;  %2140 = vmatprep.mubr.bf16.mxu1 %v1564_v37  ;;  %v3247_v6 = vmul.f32 %v2349_v40, %v3138_v63 }
 0x484   : > { %2141 = vmatmul.mubr.bf16.gmra.mrb[20].mxu1 %v1565_v22 }
 0x485   : > { %2195 = vmatpush3.bf16.msra.mxu1 %v2918_v5  ;;  %v1235_v36 = vpack.c.bf16 %v3247_v6, %v3244_v46 }
 0x486   : > { %2188 = vmatprep.subr.bf16.mxu1 %v3160_v23 }
 0x488   : > { %v1192_v10 = vpop.xlane.xlu0 %1191 }
 0x489   : > { %2352 = vrcp.f32 %v1192_v10  ;;  %2196 = vmatpush3.bf16.msra.mxu1 %v3160_v23 }
 0x48a   : > { %2354 = vrcp.f32 %v1521_v33  ;;  %2189 = vmatprep.subr.bf16.mxu1 %v3164_v49  ;;  %v2351_v5 = vpop.eup %2350 }
 0x48b   : > { %2356 = vrcp.f32 %v1515_v14  ;;  %v3257_v34 = vmul.f32 %v2351_v5, %v3151_v41 }
 0x48c   : > { %2358 = vrcp.f32 %v1519_v61  ;;  %v1517_v51 = vpop.xlane.xlu0 %1516 }
 0x48d   : > { %2360 = vrcp.f32 %v1517_v51  ;;  %2197 = vmatpush3.bf16.msra.mxu1 %v3164_v49 }
 0x490   : > { %v1188_v11 = vpop.xlane.xlu0 %1187 }
 0x493   : > { %v2353_v63 = vpop.eup %2352 }
 0x494   : > { %v2355_v18 = vpop.eup %2354  ;;  %v3260_v44 = vmul.f32 %v2353_v63, %v3171_v60  ;;  %v1186_v60 = vpop.xlane.xlu1 %1185  ;;  %v1946_v63 = vld [vmem:[%s3339_s5] ss:$0 sm:$0xff] }
 0x495   : > { %v2357_v30 = vpop.eup %2356  ;;  %v1557_v12 = vmul.f32 %v2355_v18, %v3158_v50  ;;  %v1527_v56 = vpop.xlane.xlu0 %1526 }
 0x496   : > { %v2359_v7 = vpop.eup %2358  ;;  %v1238_v23 = vpack.c.bf16 %v3260_v44, %v3257_v34  ;;  %v1554_v62 = vmul.f32 %v2357_v30, %v3145_v16 }
 0x497   : > { %v2361_v20 = vpop.eup %2360  ;;  %v1556_v21 = vmul.f32 %v2359_v7, %v3143_v42 }
 0x498   : > { %v1555_v49 = vmul.f32 %v2361_v20, %v3178_v48  ;;  %v1198_v4 = vpop.xlane.xlu1 %1197 }
 0x499   : > { %v1567_v41 = vpack.c.bf16 %v1557_v12, %v1556_v21  ;;  %v1194_v13 = vpop.xlane.xlu0 %1193 }
 0x49a   : > { %v1566_v27 = vpack.c.bf16 %v1555_v49, %v1554_v62 }
 0x49c   : > { %2144 = vmatprep.mubr.bf16.mxu1 %v1566_v27  ;;  %v1523_v59 = vpop.xlane.xlu1 %1522 }
 0x49d   : > { %2145 = vmatmul.mubr.bf16.gmra.mrb[24].mxu1 %v1567_v41 }
 0x4b7   : > { %v1529_v45 = vpop.xlane.xlu1 %1528 }
 0x4b8   : > { %2362 = vrcp.f32 %v1529_v45 }
 0x4b9   : > { %2364 = vrcp.f32 %v1523_v59 }
 0x4ba   : > { %2366 = vrcp.f32 %v1527_v56 }
 0x4bb   : > { %v1200_v16 = vpop.xlane.xlu1 %1199 }
 0x4bf   : > { %v1525_v50 = vpop.xlane.xlu0 %1524  ;;  %v1706_v9 = vpop.permute.xlu1 %1705 }
 0x4c0   : > { %2368 = vrcp.f32 %v1525_v50 }
 0x4c1   : > { %2370 = vrcp.f32 %v1194_v13 }
 0x4c2   : > { %v2363_v42 = vpop.eup %2362 }
 0x4c3   : > { %v1196_v48 = vpop.xlane.xlu0 %1195  ;;  %v2365_v61 = vpop.eup %2364  ;;  %v1561_v29 = vmul.f32 %v2363_v42, %v3195_v28 }
 0x4c4   : > { %2372 = vrcp.f32 %v1196_v48  ;;  %v2367_v47 = vpop.eup %2366  ;;  %v1558_v54 = vmul.f32 %v2365_v61, %v3176_v57 }
 0x4c5   : > { %2374 = vrcp.f32 %v1188_v11  ;;  %v1560_v35 = vmul.f32 %v2367_v47, %v3185_v3 }
 0x4c6   : > { %2376 = vrcp.f32 %v1186_v60 }
 0x4c7   : > { %v1704_v24 = vpop.permute.xlu0 %1703  ;;  %2378 = vrcp.f32 %v1200_v16  ;;  %v1569_v37 = vpack.c.bf16 %v1561_v29, %v1560_v35 }
 0x4c8   : > { %2164 = vmatprep.subr.bf16.mxu0 %v1704_v24  ;;  %2190 = vmatprep.subr.bf16.mxu1 %v1704_v24  ;;  %2380 = vrcp.f32 %v1198_v4 }
 0x4c9   : > { %2165 = vmatpush3.bf16.msra.mxu0 %v1704_v24  ;;  %2198 = vmatpush3.bf16.msra.mxu1 %v1704_v24 }
 0x4ca   : > { %v2369_v25 = vpop.eup %2368  ;;  %2166 = vmatprep.subr.bf16.mxu0 %v1706_v9  ;;  %2191 = vmatprep.subr.bf16.mxu1 %v1706_v9 }
 0x4cb   : > { %v1559_v31 = vmul.f32 %v2369_v25, %v3201_v17  ;;  %v2371_v1 = vpop.eup %2370 }
 0x4cc   : > { %v1229_v40 = vmul.f32 %v2371_v1, %v3188_v53 }
 0x4cd   : > { %2167 = vmatpush3.bf16.msra.mxu0 %v1706_v9  ;;  %2199 = vmatpush3.bf16.msra.mxu1 %v1706_v9  ;;  %v1568_v8 = vpack.c.bf16 %v1559_v31, %v1558_v54 }
 0x4ce   : > { %v2373_v32 = vpop.eup %2372 }
 0x4cf   : > { %2148 = vmatprep.mubr.bf16.mxu1 %v1568_v8  ;;  %v1230_v22 = vmul.f32 %v2373_v32, %v3204_v52  ;;  %v2375_v33 = vpop.eup %2374 }
 0x4d0   : > { %2149 = vmatmul.mubr.bf16.gmra.mrb[28].mxu1 %v1569_v37  ;;  %2169 = vmatmul.mubr.bf16.vlgmr.msra.gmra.mrb[32].mxu0 %v1234_v0  ;;  %v2377_v3 = vpop.eup %2376  ;;  %v1226_v17 = vmul.f32 %v2375_v33, %v3182_v15 }
 0x4d1   : > { %2172 = vmatprep.mubr.bf16.mxu0 %v1235_v36  ;;  %v1239_v57 = vpack.c.bf16 %v1230_v22, %v1229_v40  ;;  %v2379_v28 = vpop.eup %2378  ;;  %v1225_v53 = vmul.f32 %v2377_v3, %v3153_v2 }
 0x4d2   : > { %v2381_v14 = vpop.eup %2380  ;;  %v1232_v52 = vmul.f32 %v2379_v28, %v3198_v19 }
 0x4d3   : > { %2180 = vmatprep.mubr.bf16.mxu1 %v1239_v57  ;;  %v1237_v10 = vpack.c.bf16 %v1226_v17, %v1225_v53  ;;  %v1231_v51 = vmul.f32 %v2381_v14, %v3168_v26 }
 0x4d5   : > { %v1240_v39 = vpack.c.bf16 %v1232_v52, %v1231_v51 }
 0x4d8   : > { %2173 = vmatmul.mubr.bf16.gmra.mrb[36].mxu0 %v1236_v58 }
 0x4d9   : > { %2176 = vmatprep.mubr.bf16.mxu0 %v1237_v10 }
 0x4dc   : > { %2181 = vmatmul.mubr.bf16.vlgmr.msra.gmra.mrb[28].mxu1 %v1240_v39 }
 0x4e0   : > { %2177 = vmatmul.mubr.bf16.gmra.mrb[40].mxu0 %v1238_v23 }
 0x54b   : > { %v2138_v15 = vpop.f32.mrb[16].mxu1 }
 0x54c   : > { %v1628_v43 = vpop.f32.mrb[17].mxu1 }
 0x54d   : > { %v2139_v2 = vpop.f32.mrb[18].mxu1 }
 0x54e   : > { %v1631_v0 = vpop.f32.mrb[19].mxu1 }
 0x557   : > { %v2142_v19 = vpop.f32.mrb[20].mxu1 }
 0x558   : > { %v1644_v46 = vpop.f32.mrb[21].mxu1 }
 0x559   : > { %v2143_v6 = vpop.f32.mrb[22].mxu1 }
 0x55a   : > { %v1647_v26 = vpop.f32.mrb[23].mxu1 }
 0x570   : > { %v2146_v36 = vpop.f32.mrb[24].mxu1 }
 0x571   : > { %v1660_v5 = vpop.f32.mrb[25].mxu1 }
 0x572   : > { %v2147_v38 = vpop.f32.mrb[26].mxu1 }
 0x573   : > { %v1663_v55 = vpop.f32.mrb[27].mxu1 }
 0x5a3   : > { %v2170_v58 = vpop.f32.mrb[32].mxu0 }
 0x5a4   : > { %v1758_v18 = vadd.f32 %v2170_v58, %v2138_v15  ;;  %v1749_v34 = vpop.f32.mrb[33].mxu0 }
 0x5a5   : > { %v1750_v44 = vadd.f32 %v1749_v34, %v1628_v43  ;;  %v2171_v30 = vpop.f32.mrb[34].mxu0 }
 0x5a6   : > { %v1821_v7 = vadd.f32 %v1946_v63, %v1758_v18  ;;  %v1761_v23 = vadd.f32 %v2171_v30, %v2139_v2  ;;  %v1752_v20 = vpop.f32.mrb[35].mxu0 }
 0x5a7   : > { %v1819_v12 = vadd.f32 %v1946_v63, %v1750_v44  ;;  %v1753_v62 = vadd.f32 %v1752_v20, %v1631_v0 }
 0x5a8   : > { %1837 = vst.msk [vmem:[%s3297_s14 + $0x10] sm:$0xff] %vm367_vm3, %v1821_v7  ;;  %v1822_v49 = vadd.f32 %v1946_v63, %v1761_v23 }
 0x5a9   : > { %1835 = vst.msk [vmem:[%s3297_s14] sm:$0xff] %vm367_vm3, %v1819_v12  ;;  %v1820_v21 = vadd.f32 %v1946_v63, %v1753_v62 }
 0x5aa   : > { %1838 = vst.msk [vmem:[%s3297_s14 + $0x18] sm:$0xff] %vm367_vm3, %v1822_v49 }
 0x5ab   : > { %1836 = vst.msk [vmem:[%s3297_s14 + $0x8] sm:$0xff] %vm367_vm3, %v1820_v21  ;;  %v2174_v27 = vpop.f32.mrb[36].mxu0 }
 0x5ac   : > { %v1774_v41 = vadd.f32 %v2174_v27, %v2142_v19  ;;  %v1765_v60 = vpop.f32.mrb[37].mxu0 }
 0x5ad   : > { %v1766_v11 = vadd.f32 %v1765_v60, %v1644_v46  ;;  %v2175_v4 = vpop.f32.mrb[38].mxu0 }
 0x5ae   : > { %v1825_v56 = vadd.f32 %v1946_v63, %v1774_v41  ;;  %v1777_v59 = vadd.f32 %v2175_v4, %v2143_v6  ;;  %v1768_v45 = vpop.f32.mrb[39].mxu0 }
 0x5af   : > { %v1823_v13 = vadd.f32 %v1946_v63, %v1766_v11  ;;  %v1769_v50 = vadd.f32 %v1768_v45, %v1647_v26  ;;  %v2182_v16 = vpop.f32.mrb[28].mxu1 }
 0x5b0   : > { %1841 = vst.msk [vmem:[%s3297_s14 + $0x30] sm:$0xff] %vm367_vm3, %v1825_v56  ;;  %v1826_v48 = vadd.f32 %v1946_v63, %v1777_v59  ;;  %v1833_v42 = vadd.f32 %v2182_v16, %v1946_v63  ;;  %v1797_v24 = vpop.f32.mrb[29].mxu1 }
 0x5b1   : > { %1839 = vst.msk [vmem:[%s3297_s14 + $0x20] sm:$0xff] %vm367_vm3, %v1823_v13  ;;  %v1824_v61 = vadd.f32 %v1946_v63, %v1769_v50  ;;  %v1831_v47 = vadd.f32 %v1946_v63, %v1797_v24  ;;  %v2183_v9 = vpop.f32.mrb[30].mxu1 }
 0x5b2   : > { %1842 = vst.msk [vmem:[%s3297_s14 + $0x38] sm:$0xff] %vm367_vm3, %v1826_v48  ;;  %1849 = vst.msk [vmem:[%s3297_s14 + $0x70] sm:$0xff] %vm367_vm3, %v1833_v42  ;;  %v1834_v25 = vadd.f32 %v2183_v9, %v1946_v63  ;;  %v1800_v29 = vpop.f32.mrb[31].mxu1 }
 0x5b3   : > { %1840 = vst.msk [vmem:[%s3297_s14 + $0x28] sm:$0xff] %vm367_vm3, %v1824_v61  ;;  %1847 = vst.msk [vmem:[%s3297_s14 + $0x60] sm:$0xff] %vm367_vm3, %v1831_v47  ;;  %v1832_v54 = vadd.f32 %v1946_v63, %v1800_v29  ;;  %v2178_v31 = vpop.f32.mrb[40].mxu0 }
 0x5b4   : > { %1850 = vst.msk [vmem:[%s3297_s14 + $0x78] sm:$0xff] %vm367_vm3, %v1834_v25  ;;  %v1790_v1 = vadd.f32 %v2178_v31, %v2146_v36  ;;  %v1781_v35 = vpop.f32.mrb[41].mxu0 }
 0x5b5   : > { %1848 = vst.msk [vmem:[%s3297_s14 + $0x68] sm:$0xff] %vm367_vm3, %v1832_v54  ;;  %v1782_v8 = vadd.f32 %v1781_v35, %v1660_v5  ;;  %v2179_v32 = vpop.f32.mrb[42].mxu0 }
 0x5b6   : > { %v1829_v37 = vadd.f32 %v1946_v63, %v1790_v1  ;;  %v1793_v40 = vadd.f32 %v2179_v32, %v2147_v38  ;;  %v1784_v22 = vpop.f32.mrb[43].mxu0 }
 0x5b7   : > { %v1827_v33 = vadd.f32 %v1946_v63, %v1782_v8  ;;  %v1785_v57 = vadd.f32 %v1784_v22, %v1663_v55 }
 0x5b8   : > { %1845 = vst.msk [vmem:[%s3297_s14 + $0x50] sm:$0xff] %vm367_vm3, %v1829_v37  ;;  %v1830_v3 = vadd.f32 %v1946_v63, %v1793_v40 }
 0x5b9   : > { %1843 = vst.msk [vmem:[%s3297_s14 + $0x40] sm:$0xff] %vm367_vm3, %v1827_v33  ;;  %v1828_v28 = vadd.f32 %v1946_v63, %v1785_v57 }
 0x5ba   : > { %1846 = vst.msk [vmem:[%s3297_s14 + $0x58] sm:$0xff] %vm367_vm3, %v1830_v3 }
 0x5bb   : > { %1844 = vst.msk [vmem:[%s3297_s14 + $0x48] sm:$0xff] %vm367_vm3, %v1828_v28 }
 0x5bc PF: > { %s16_s21 = sadd.s32 1, %s2388_s21  }
 0x5bd   : > { %p13_p4 = scmp.ge.s32.totalorder %s16_s21, 4  }
 0x5bf   :  { %15 = sbr.rel (!%p13_p4) target bundleno = 1 (0x1), region = 76 }

</bundles_post_ra>
